<compile_context>
chip_gen: v5e
topology: v5e:2x2
jax: 0.10.0
libtpu: 0.0.40
codegen_flags: <defaults>
</compile_context>

<pallas_src>
import math

import jax
import jax.numpy as jnp
from jax import lax
from jax.experimental import pallas as pl
from jax.experimental.pallas import tpu as pltpu  # noqa: F401  (no grid/pipelining needed)

# ---- small, module-consistent shapes ----
B = 2            # batch
S = 8            # seq_len
E = 32           # embed_dim
H = 4            # num_heads
DH = E // H      # head dim
FF = 64          # dim_feedforward (small stand-in for PyTorch default 2048)
VOCAB = 128      # vocab_size (multiple of 128 -> lane-dense classifier output)
NUM_LAYERS = 2
EPS = 1e-5       # LayerNorm eps (PyTorch default)


def _layer_norm(y, gamma, beta):
    mu = jnp.mean(y, axis=-1, keepdims=True)
    var = jnp.mean((y - mu) ** 2, axis=-1, keepdims=True)
    return (y - mu) * lax.rsqrt(var + EPS) * gamma + beta


def fused_model_kernel(emb_ref, pos_ref, *refs):
    """pos add + both post-norm encoder layers + classifier; VMEM-resident, no grid."""
    *param_refs, o_ref = refs
    layer_refs = param_refs[:NUM_LAYERS * 12]
    wfc_ref, bfc_ref = param_refs[NUM_LAYERS * 12:]

    # positional encoding add (broadcast over batch), then fold batch into rows
    x = (emb_ref[...] + pos_ref[...]).reshape(B * S, E)      # (B*S, E)
    scale = 1.0 / math.sqrt(DH)

    for l in range(NUM_LAYERS):                              # static unroll (2 layers)
        (wqkv, bqkv, wo, bo, g1, beta1, w1, bf1,
         w2, bf2, g2, beta2) = layer_refs[l * 12:(l + 1) * 12]

        # ---- fused QKV projection over all B*S rows ----
        qkv = jnp.dot(x, wqkv[...], preferred_element_type=jnp.float32) + bqkv[...]
        qkv3 = qkv.reshape(B, S, 3 * E)                      # free reshape (leading-dim split)

        # ---- multi-head self-attention: per head, batched over B ----
        head_ctx = []
        for h in range(H):                                   # static unroll, H=4
            qh = qkv3[:, :, 0 * E + h * DH:0 * E + (h + 1) * DH]   # (B, S, DH)
            kh = qkv3[:, :, 1 * E + h * DH:1 * E + (h + 1) * DH]
            vh = qkv3[:, :, 2 * E + h * DH:2 * E + (h + 1) * DH]
            sc = jnp.einsum('bqd,bkd->bqk', qh, kh,
                            preferred_element_type=jnp.float32) * scale   # (B, S, S)
            sc = sc - jnp.max(sc, axis=-1, keepdims=True)
            p = jnp.exp(sc)
            p = p * pl.reciprocal(jnp.sum(p, axis=-1, keepdims=True), approx=True)
            head_ctx.append(jnp.einsum('bqk,bkd->bqd', p, vh,
                                       preferred_element_type=jnp.float32))  # (B, S, DH)
        ctx = jnp.concatenate(head_ctx, axis=-1).reshape(B * S, E)            # (B*S, E)
        attn = jnp.dot(ctx, wo[...], preferred_element_type=jnp.float32) + bo[...]

        # TODO(synk): dropout layers are eval-mode identities and are omitted.

        # ---- residual + LayerNorm 1 (post-norm, PyTorch default) ----
        y = _layer_norm(x + attn, g1[...], beta1[...])

        # ---- feed forward (ReLU, PyTorch default) ----
        hmid = jnp.maximum(
            jnp.dot(y, w1[...], preferred_element_type=jnp.float32) + bf1[...], 0.0)
        ff = jnp.dot(hmid, w2[...], preferred_element_type=jnp.float32) + bf2[...]

        # ---- residual + LayerNorm 2 ----
        x = _layer_norm(y + ff, g2[...], beta2[...])

    # ---- final classifier: flatten each batch's (S, E) rows into S*E lanes,
    #      then a single lane-dense (B, S*E) @ (S*E, VOCAB) matmul ----
    x3 = x.reshape(B, S, E)                                                   # free reshape
    x_flat = jnp.concatenate([x3[:, s, :] for s in range(S)], axis=-1)        # (B, S*E)
    o_ref[...] = jnp.dot(x_flat, wfc_ref[...],
                         preferred_element_type=jnp.float32) + bfc_ref[...]   # (B, VOCAB)


def _flops_estimate():
    per_layer = (2 * B * S * E * 3 * E            # qkv proj
                 + 2 * B * H * S * S * DH * 2     # scores + context
                 + 2 * B * S * E * E              # out proj
                 + 2 * B * S * E * FF * 2)        # ff1 + ff2
    return NUM_LAYERS * per_layer + 2 * B * (S * E) * VOCAB


def simple_model_forward(tokens, params):
    # glue: only the data-dependent embedding gather stays in XLA
    emb = jnp.take(params["embedding"], tokens, axis=0)      # (B, S, E)

    flat_params = []
    for lp in params["layers"]:
        flat_params.extend(lp)
    flat_params += [params["fc_w"], params["fc_b"]]

    bytes_accessed = 4 * (B * S * E + S * E
                          + sum(int(p.size) for p in flat_params) + B * VOCAB)
    cost = pl.CostEstimate(
        flops=_flops_estimate(),
        transcendentals=NUM_LAYERS * (B * H * S * S + B * H * S + 2 * B * S),
        bytes_accessed=bytes_accessed)

    return pl.pallas_call(
        fused_model_kernel,
        out_shape=jax.ShapeDtypeStruct((B, VOCAB), jnp.float32),
        cost_estimate=cost,
    )(emb, params["pos"], *flat_params)


# ---------------- parameter setup (deterministic, in-script) ----------------
def _linear(key, fan_in, fan_out):
    kw, kb = jax.random.split(key)
    lim = 1.0 / math.sqrt(fan_in)
    w = jax.random.uniform(kw, (fan_in, fan_out), jnp.float32, -lim, lim)
    b = jax.random.uniform(kb, (1, fan_out), jnp.float32, -lim, lim)
    return w, b


def init_params(key):
    keys = jax.random.split(key, 3 + NUM_LAYERS)
    params = {
        "embedding": jax.random.normal(keys[0], (VOCAB, E), jnp.float32) * 0.02,
        # nn.Parameter(torch.zeros(1, S, E)) — small deterministic values so the
        # positional add is exercised.
        "pos": jax.random.normal(keys[1], (1, S, E), jnp.float32) * 0.02,
    }
    fc_w, fc_b = _linear(keys[2], E * S, VOCAB)
    params["fc_w"], params["fc_b"] = fc_w, fc_b

    layers = []
    for l in range(NUM_LAYERS):
        lk = jax.random.split(keys[3 + l], 4)
        wqkv, bqkv = _linear(lk[0], E, 3 * E)      # in_proj (already (in, out))
        wo, bo = _linear(lk[1], E, E)              # out_proj
        w1, bf1 = _linear(lk[2], E, FF)            # linear1
        w2, bf2 = _linear(lk[3], FF, E)            # linear2
        g1 = jnp.ones((1, E), jnp.float32)
        beta1 = jnp.zeros((1, E), jnp.float32)
        g2 = jnp.ones((1, E), jnp.float32)
        beta2 = jnp.zeros((1, E), jnp.float32)
        layers.append((wqkv, bqkv, wo, bo, g1, beta1, w1, bf1, w2, bf2, g2, beta2))
    params["layers"] = layers
    return params


if __name__ == "__main__":
    key = jax.random.PRNGKey(0)
    kp, kt = jax.random.split(key)
    params = init_params(kp)
    tokens = jax.random.randint(kt, (B, S), 0, VOCAB, dtype=jnp.int32)

    out = simple_model_forward(tokens, params)
    out = jax.block_until_ready(out)
    assert out.shape == (B, VOCAB) and out.dtype == jnp.float32
    print("KERNEL_OK")
</pallas_src>

<mosaic_0001>
module attributes {stable_mosaic.version = 11 : i64} {
  func.func @fused_model_kernel(%arg0: memref<2x8x32xf32, #tpu.memory_space<vmem>>, %arg1: memref<1x8x32xf32, #tpu.memory_space<vmem>>, %arg2: memref<32x96xf32, #tpu.memory_space<vmem>>, %arg3: memref<1x96xf32, #tpu.memory_space<vmem>>, %arg4: memref<32x32xf32, #tpu.memory_space<vmem>>, %arg5: memref<1x32xf32, #tpu.memory_space<vmem>>, %arg6: memref<1x32xf32, #tpu.memory_space<vmem>>, %arg7: memref<1x32xf32, #tpu.memory_space<vmem>>, %arg8: memref<32x64xf32, #tpu.memory_space<vmem>>, %arg9: memref<1x64xf32, #tpu.memory_space<vmem>>, %arg10: memref<64x32xf32, #tpu.memory_space<vmem>>, %arg11: memref<1x32xf32, #tpu.memory_space<vmem>>, %arg12: memref<1x32xf32, #tpu.memory_space<vmem>>, %arg13: memref<1x32xf32, #tpu.memory_space<vmem>>, %arg14: memref<32x96xf32, #tpu.memory_space<vmem>>, %arg15: memref<1x96xf32, #tpu.memory_space<vmem>>, %arg16: memref<32x32xf32, #tpu.memory_space<vmem>>, %arg17: memref<1x32xf32, #tpu.memory_space<vmem>>, %arg18: memref<1x32xf32, #tpu.memory_space<vmem>>, %arg19: memref<1x32xf32, #tpu.memory_space<vmem>>, %arg20: memref<32x64xf32, #tpu.memory_space<vmem>>, %arg21: memref<1x64xf32, #tpu.memory_space<vmem>>, %arg22: memref<64x32xf32, #tpu.memory_space<vmem>>, %arg23: memref<1x32xf32, #tpu.memory_space<vmem>>, %arg24: memref<1x32xf32, #tpu.memory_space<vmem>>, %arg25: memref<1x32xf32, #tpu.memory_space<vmem>>, %arg26: memref<256x128xf32, #tpu.memory_space<vmem>>, %arg27: memref<1x128xf32, #tpu.memory_space<vmem>>, %arg28: memref<2x128xf32, #tpu.memory_space<vmem>>) attributes {dimension_semantics = [], scalar_prefetch = 0 : i64, scratch_operands = 0 : i64, tpu.core_type = #tpu.core_type<tc>} {
    %c0 = arith.constant 0 : index
    %c0_0 = arith.constant 0 : index
    %c0_1 = arith.constant 0 : index
    %0 = vector.load %arg0[%c0, %c0_0, %c0_1] : memref<2x8x32xf32, #tpu.memory_space<vmem>>, vector<2x8x32xf32>
    %c0_2 = arith.constant 0 : index
    %c0_3 = arith.constant 0 : index
    %c0_4 = arith.constant 0 : index
    %1 = vector.load %arg1[%c0_2, %c0_3, %c0_4] : memref<1x8x32xf32, #tpu.memory_space<vmem>>, vector<1x8x32xf32>
    %2 = vector.broadcast %1 : vector<1x8x32xf32> to vector<2x8x32xf32>
    %3 = arith.addf %0, %2 : vector<2x8x32xf32>
    %4 = vector.shape_cast %3 : vector<2x8x32xf32> to vector<16x32xf32>
    %c0_5 = arith.constant 0 : index
    %c0_6 = arith.constant 0 : index
    %5 = vector.load %arg2[%c0_5, %c0_6] : memref<32x96xf32, #tpu.memory_space<vmem>>, vector<32x96xf32>
    %cst = arith.constant dense<0.000000e+00> : vector<16x96xf32>
    %6 = tpu.matmul %4, %5, %cst {dimension_numbers = #tpu.dot_dimension_numbers<[1], [0], [0], [1], [0, 0, 1, 1], [], []>} : vector<16x32xf32>, vector<32x96xf32>, vector<16x96xf32> -> vector<16x96xf32>
    %c0_7 = arith.constant 0 : index
    %c0_8 = arith.constant 0 : index
    %7 = vector.load %arg3[%c0_7, %c0_8] : memref<1x96xf32, #tpu.memory_space<vmem>>, vector<1x96xf32>
    %8 = vector.broadcast %7 : vector<1x96xf32> to vector<16x96xf32>
    %9 = arith.addf %6, %8 : vector<16x96xf32>
    %10 = vector.shape_cast %9 : vector<16x96xf32> to vector<2x8x96xf32>
    %11 = vector.extract_strided_slice %10 {offsets = [0, 0, 0], sizes = [2, 8, 8], strides = [1, 1, 1]} : vector<2x8x96xf32> to vector<2x8x8xf32>
    %12 = vector.extract_strided_slice %10 {offsets = [0, 0, 32], sizes = [2, 8, 8], strides = [1, 1, 1]} : vector<2x8x96xf32> to vector<2x8x8xf32>
    %13 = vector.extract_strided_slice %10 {offsets = [0, 0, 64], sizes = [2, 8, 8], strides = [1, 1, 1]} : vector<2x8x96xf32> to vector<2x8x8xf32>
    "tpu.trace_start"() <{level = 10 : i32, message = "bqd,bkd->bqk"}> : () -> ()
    %cst_9 = arith.constant dense<0.000000e+00> : vector<2x8x8xf32>
    %14 = tpu.matmul %11, %12, %cst_9 {dimension_numbers = #tpu.dot_dimension_numbers<[2], [2], [1], [1], [0, 0, 0, 1, 1, 1], [0], [0]>} : vector<2x8x8xf32>, vector<2x8x8xf32>, vector<2x8x8xf32> -> vector<2x8x8xf32>
    "tpu.trace_stop"() : () -> ()
    %cst_10 = arith.constant 0.353553385 : f32
    %15 = vector.broadcast %cst_10 : f32 to vector<2x8x8xf32>
    %16 = arith.mulf %14, %15 : vector<2x8x8xf32>
    %cst_11 = arith.constant dense<0xFF800000> : vector<2x8xf32>
    %17 = vector.multi_reduction <maximumf>, %16, %cst_11 [2] : vector<2x8x8xf32> to vector<2x8xf32>
    %18 = vector.shape_cast %17 : vector<2x8xf32> to vector<2x8x1xf32>
    %19 = vector.broadcast %18 : vector<2x8x1xf32> to vector<2x8x8xf32>
    %20 = arith.subf %16, %19 : vector<2x8x8xf32>
    %21 = math.exp %20 : vector<2x8x8xf32>
    %cst_12 = arith.constant dense<0.000000e+00> : vector<2x8xf32>
    %22 = vector.multi_reduction <add>, %21, %cst_12 [2] : vector<2x8x8xf32> to vector<2x8xf32>
    %23 = vector.shape_cast %22 : vector<2x8xf32> to vector<2x8x1xf32>
    %24 = tpu.reciprocal %23 {approx = true} : vector<2x8x1xf32> -> vector<2x8x1xf32>
    %25 = vector.broadcast %24 : vector<2x8x1xf32> to vector<2x8x8xf32>
    %26 = arith.mulf %21, %25 : vector<2x8x8xf32>
    "tpu.trace_start"() <{level = 10 : i32, message = "bqk,bkd->bqd"}> : () -> ()
    %cst_13 = arith.constant dense<0.000000e+00> : vector<2x8x8xf32>
    %27 = tpu.matmul %26, %13, %cst_13 {dimension_numbers = #tpu.dot_dimension_numbers<[2], [1], [1], [2], [0, 0, 0, 1, 1, 2], [0], [0]>} : vector<2x8x8xf32>, vector<2x8x8xf32>, vector<2x8x8xf32> -> vector<2x8x8xf32>
    "tpu.trace_stop"() : () -> ()
    %28 = vector.extract_strided_slice %10 {offsets = [0, 0, 8], sizes = [2, 8, 8], strides = [1, 1, 1]} : vector<2x8x96xf32> to vector<2x8x8xf32>
    %29 = vector.extract_strided_slice %10 {offsets = [0, 0, 40], sizes = [2, 8, 8], strides = [1, 1, 1]} : vector<2x8x96xf32> to vector<2x8x8xf32>
    %30 = vector.extract_strided_slice %10 {offsets = [0, 0, 72], sizes = [2, 8, 8], strides = [1, 1, 1]} : vector<2x8x96xf32> to vector<2x8x8xf32>
    "tpu.trace_start"() <{level = 10 : i32, message = "bqd,bkd->bqk"}> : () -> ()
    %cst_14 = arith.constant dense<0.000000e+00> : vector<2x8x8xf32>
    %31 = tpu.matmul %28, %29, %cst_14 {dimension_numbers = #tpu.dot_dimension_numbers<[2], [2], [1], [1], [0, 0, 0, 1, 1, 1], [0], [0]>} : vector<2x8x8xf32>, vector<2x8x8xf32>, vector<2x8x8xf32> -> vector<2x8x8xf32>
    "tpu.trace_stop"() : () -> ()
    %cst_15 = arith.constant 0.353553385 : f32
    %32 = vector.broadcast %cst_15 : f32 to vector<2x8x8xf32>
    %33 = arith.mulf %31, %32 : vector<2x8x8xf32>
    %cst_16 = arith.constant dense<0xFF800000> : vector<2x8xf32>
    %34 = vector.multi_reduction <maximumf>, %33, %cst_16 [2] : vector<2x8x8xf32> to vector<2x8xf32>
    %35 = vector.shape_cast %34 : vector<2x8xf32> to vector<2x8x1xf32>
    %36 = vector.broadcast %35 : vector<2x8x1xf32> to vector<2x8x8xf32>
    %37 = arith.subf %33, %36 : vector<2x8x8xf32>
    %38 = math.exp %37 : vector<2x8x8xf32>
    %cst_17 = arith.constant dense<0.000000e+00> : vector<2x8xf32>
    %39 = vector.multi_reduction <add>, %38, %cst_17 [2] : vector<2x8x8xf32> to vector<2x8xf32>
    %40 = vector.shape_cast %39 : vector<2x8xf32> to vector<2x8x1xf32>
    %41 = tpu.reciprocal %40 {approx = true} : vector<2x8x1xf32> -> vector<2x8x1xf32>
    %42 = vector.broadcast %41 : vector<2x8x1xf32> to vector<2x8x8xf32>
    %43 = arith.mulf %38, %42 : vector<2x8x8xf32>
    "tpu.trace_start"() <{level = 10 : i32, message = "bqk,bkd->bqd"}> : () -> ()
    %cst_18 = arith.constant dense<0.000000e+00> : vector<2x8x8xf32>
    %44 = tpu.matmul %43, %30, %cst_18 {dimension_numbers = #tpu.dot_dimension_numbers<[2], [1], [1], [2], [0, 0, 0, 1, 1, 2], [0], [0]>} : vector<2x8x8xf32>, vector<2x8x8xf32>, vector<2x8x8xf32> -> vector<2x8x8xf32>
    "tpu.trace_stop"() : () -> ()
    %45 = vector.extract_strided_slice %10 {offsets = [0, 0, 16], sizes = [2, 8, 8], strides = [1, 1, 1]} : vector<2x8x96xf32> to vector<2x8x8xf32>
    %46 = vector.extract_strided_slice %10 {offsets = [0, 0, 48], sizes = [2, 8, 8], strides = [1, 1, 1]} : vector<2x8x96xf32> to vector<2x8x8xf32>
    %47 = vector.extract_strided_slice %10 {offsets = [0, 0, 80], sizes = [2, 8, 8], strides = [1, 1, 1]} : vector<2x8x96xf32> to vector<2x8x8xf32>
    "tpu.trace_start"() <{level = 10 : i32, message = "bqd,bkd->bqk"}> : () -> ()
    %cst_19 = arith.constant dense<0.000000e+00> : vector<2x8x8xf32>
    %48 = tpu.matmul %45, %46, %cst_19 {dimension_numbers = #tpu.dot_dimension_numbers<[2], [2], [1], [1], [0, 0, 0, 1, 1, 1], [0], [0]>} : vector<2x8x8xf32>, vector<2x8x8xf32>, vector<2x8x8xf32> -> vector<2x8x8xf32>
    "tpu.trace_stop"() : () -> ()
    %cst_20 = arith.constant 0.353553385 : f32
    %49 = vector.broadcast %cst_20 : f32 to vector<2x8x8xf32>
    %50 = arith.mulf %48, %49 : vector<2x8x8xf32>
    %cst_21 = arith.constant dense<0xFF800000> : vector<2x8xf32>
    %51 = vector.multi_reduction <maximumf>, %50, %cst_21 [2] : vector<2x8x8xf32> to vector<2x8xf32>
    %52 = vector.shape_cast %51 : vector<2x8xf32> to vector<2x8x1xf32>
    %53 = vector.broadcast %52 : vector<2x8x1xf32> to vector<2x8x8xf32>
    %54 = arith.subf %50, %53 : vector<2x8x8xf32>
    %55 = math.exp %54 : vector<2x8x8xf32>
    %cst_22 = arith.constant dense<0.000000e+00> : vector<2x8xf32>
    %56 = vector.multi_reduction <add>, %55, %cst_22 [2] : vector<2x8x8xf32> to vector<2x8xf32>
    %57 = vector.shape_cast %56 : vector<2x8xf32> to vector<2x8x1xf32>
    %58 = tpu.reciprocal %57 {approx = true} : vector<2x8x1xf32> -> vector<2x8x1xf32>
    %59 = vector.broadcast %58 : vector<2x8x1xf32> to vector<2x8x8xf32>
    %60 = arith.mulf %55, %59 : vector<2x8x8xf32>
    "tpu.trace_start"() <{level = 10 : i32, message = "bqk,bkd->bqd"}> : () -> ()
    %cst_23 = arith.constant dense<0.000000e+00> : vector<2x8x8xf32>
    %61 = tpu.matmul %60, %47, %cst_23 {dimension_numbers = #tpu.dot_dimension_numbers<[2], [1], [1], [2], [0, 0, 0, 1, 1, 2], [0], [0]>} : vector<2x8x8xf32>, vector<2x8x8xf32>, vector<2x8x8xf32> -> vector<2x8x8xf32>
    "tpu.trace_stop"() : () -> ()
    %62 = vector.extract_strided_slice %10 {offsets = [0, 0, 24], sizes = [2, 8, 8], strides = [1, 1, 1]} : vector<2x8x96xf32> to vector<2x8x8xf32>
    %63 = vector.extract_strided_slice %10 {offsets = [0, 0, 56], sizes = [2, 8, 8], strides = [1, 1, 1]} : vector<2x8x96xf32> to vector<2x8x8xf32>
    %64 = vector.extract_strided_slice %10 {offsets = [0, 0, 88], sizes = [2, 8, 8], strides = [1, 1, 1]} : vector<2x8x96xf32> to vector<2x8x8xf32>
    "tpu.trace_start"() <{level = 10 : i32, message = "bqd,bkd->bqk"}> : () -> ()
    %cst_24 = arith.constant dense<0.000000e+00> : vector<2x8x8xf32>
    %65 = tpu.matmul %62, %63, %cst_24 {dimension_numbers = #tpu.dot_dimension_numbers<[2], [2], [1], [1], [0, 0, 0, 1, 1, 1], [0], [0]>} : vector<2x8x8xf32>, vector<2x8x8xf32>, vector<2x8x8xf32> -> vector<2x8x8xf32>
    "tpu.trace_stop"() : () -> ()
    %cst_25 = arith.constant 0.353553385 : f32
    %66 = vector.broadcast %cst_25 : f32 to vector<2x8x8xf32>
    %67 = arith.mulf %65, %66 : vector<2x8x8xf32>
    %cst_26 = arith.constant dense<0xFF800000> : vector<2x8xf32>
    %68 = vector.multi_reduction <maximumf>, %67, %cst_26 [2] : vector<2x8x8xf32> to vector<2x8xf32>
    %69 = vector.shape_cast %68 : vector<2x8xf32> to vector<2x8x1xf32>
    %70 = vector.broadcast %69 : vector<2x8x1xf32> to vector<2x8x8xf32>
    %71 = arith.subf %67, %70 : vector<2x8x8xf32>
    %72 = math.exp %71 : vector<2x8x8xf32>
    %cst_27 = arith.constant dense<0.000000e+00> : vector<2x8xf32>
    %73 = vector.multi_reduction <add>, %72, %cst_27 [2] : vector<2x8x8xf32> to vector<2x8xf32>
    %74 = vector.shape_cast %73 : vector<2x8xf32> to vector<2x8x1xf32>
    %75 = tpu.reciprocal %74 {approx = true} : vector<2x8x1xf32> -> vector<2x8x1xf32>
    %76 = vector.broadcast %75 : vector<2x8x1xf32> to vector<2x8x8xf32>
    %77 = arith.mulf %72, %76 : vector<2x8x8xf32>
    "tpu.trace_start"() <{level = 10 : i32, message = "bqk,bkd->bqd"}> : () -> ()
    %cst_28 = arith.constant dense<0.000000e+00> : vector<2x8x8xf32>
    %78 = tpu.matmul %77, %64, %cst_28 {dimension_numbers = #tpu.dot_dimension_numbers<[2], [1], [1], [2], [0, 0, 0, 1, 1, 2], [0], [0]>} : vector<2x8x8xf32>, vector<2x8x8xf32>, vector<2x8x8xf32> -> vector<2x8x8xf32>
    "tpu.trace_stop"() : () -> ()
    %79 = tpu.concatenate %27, %44, %61, %78 in 2 : vector<2x8x8xf32>, vector<2x8x8xf32>, vector<2x8x8xf32>, vector<2x8x8xf32> -> vector<2x8x32xf32>
    %80 = vector.shape_cast %79 : vector<2x8x32xf32> to vector<16x32xf32>
    %c0_29 = arith.constant 0 : index
    %c0_30 = arith.constant 0 : index
    %81 = vector.load %arg4[%c0_29, %c0_30] : memref<32x32xf32, #tpu.memory_space<vmem>>, vector<32x32xf32>
    %cst_31 = arith.constant dense<0.000000e+00> : vector<16x32xf32>
    %82 = tpu.matmul %80, %81, %cst_31 {dimension_numbers = #tpu.dot_dimension_numbers<[1], [0], [0], [1], [0, 0, 1, 1], [], []>} : vector<16x32xf32>, vector<32x32xf32>, vector<16x32xf32> -> vector<16x32xf32>
    %c0_32 = arith.constant 0 : index
    %c0_33 = arith.constant 0 : index
    %83 = vector.load %arg5[%c0_32, %c0_33] : memref<1x32xf32, #tpu.memory_space<vmem>>, vector<1x32xf32>
    %84 = vector.broadcast %83 : vector<1x32xf32> to vector<16x32xf32>
    %85 = arith.addf %82, %84 : vector<16x32xf32>
    %86 = arith.addf %4, %85 : vector<16x32xf32>
    %c0_34 = arith.constant 0 : index
    %c0_35 = arith.constant 0 : index
    %87 = vector.load %arg6[%c0_34, %c0_35] : memref<1x32xf32, #tpu.memory_space<vmem>>, vector<1x32xf32>
    %c0_36 = arith.constant 0 : index
    %c0_37 = arith.constant 0 : index
    %88 = vector.load %arg7[%c0_36, %c0_37] : memref<1x32xf32, #tpu.memory_space<vmem>>, vector<1x32xf32>
    %cst_38 = arith.constant dense<0.000000e+00> : vector<16xf32>
    %89 = vector.multi_reduction <add>, %86, %cst_38 [1] : vector<16x32xf32> to vector<16xf32>
    %90 = vector.shape_cast %89 : vector<16xf32> to vector<16x1xf32>
    %cst_39 = arith.constant 3.200000e+01 : f32
    %91 = vector.broadcast %cst_39 : f32 to vector<16x1xf32>
    %92 = arith.divf %90, %91 : vector<16x1xf32>
    %93 = vector.broadcast %92 : vector<16x1xf32> to vector<16x32xf32>
    %94 = arith.subf %86, %93 : vector<16x32xf32>
    %95 = arith.mulf %94, %94 : vector<16x32xf32>
    %cst_40 = arith.constant dense<0.000000e+00> : vector<16xf32>
    %96 = vector.multi_reduction <add>, %95, %cst_40 [1] : vector<16x32xf32> to vector<16xf32>
    %97 = vector.shape_cast %96 : vector<16xf32> to vector<16x1xf32>
    %cst_41 = arith.constant 3.200000e+01 : f32
    %98 = vector.broadcast %cst_41 : f32 to vector<16x1xf32>
    %99 = arith.divf %97, %98 : vector<16x1xf32>
    %100 = vector.broadcast %92 : vector<16x1xf32> to vector<16x32xf32>
    %101 = arith.subf %86, %100 : vector<16x32xf32>
    %cst_42 = arith.constant 9.99999974E-6 : f32
    %102 = vector.broadcast %cst_42 : f32 to vector<16x1xf32>
    %103 = arith.addf %99, %102 : vector<16x1xf32>
    %104 = math.rsqrt %103 : vector<16x1xf32>
    %105 = vector.broadcast %104 : vector<16x1xf32> to vector<16x32xf32>
    %106 = arith.mulf %101, %105 : vector<16x32xf32>
    %107 = vector.broadcast %87 : vector<1x32xf32> to vector<16x32xf32>
    %108 = arith.mulf %106, %107 : vector<16x32xf32>
    %109 = vector.broadcast %88 : vector<1x32xf32> to vector<16x32xf32>
    %110 = arith.addf %108, %109 : vector<16x32xf32>
    %c0_43 = arith.constant 0 : index
    %c0_44 = arith.constant 0 : index
    %111 = vector.load %arg8[%c0_43, %c0_44] : memref<32x64xf32, #tpu.memory_space<vmem>>, vector<32x64xf32>
    %cst_45 = arith.constant dense<0.000000e+00> : vector<16x64xf32>
    %112 = tpu.matmul %110, %111, %cst_45 {dimension_numbers = #tpu.dot_dimension_numbers<[1], [0], [0], [1], [0, 0, 1, 1], [], []>} : vector<16x32xf32>, vector<32x64xf32>, vector<16x64xf32> -> vector<16x64xf32>
    %c0_46 = arith.constant 0 : index
    %c0_47 = arith.constant 0 : index
    %113 = vector.load %arg9[%c0_46, %c0_47] : memref<1x64xf32, #tpu.memory_space<vmem>>, vector<1x64xf32>
    %114 = vector.broadcast %113 : vector<1x64xf32> to vector<16x64xf32>
    %115 = arith.addf %112, %114 : vector<16x64xf32>
    %cst_48 = arith.constant 0.000000e+00 : f32
    %116 = vector.broadcast %cst_48 : f32 to vector<16x64xf32>
    %117 = arith.maximumf %115, %116 : vector<16x64xf32>
    %c0_49 = arith.constant 0 : index
    %c0_50 = arith.constant 0 : index
    %118 = vector.load %arg10[%c0_49, %c0_50] : memref<64x32xf32, #tpu.memory_space<vmem>>, vector<64x32xf32>
    %cst_51 = arith.constant dense<0.000000e+00> : vector<16x32xf32>
    %119 = tpu.matmul %117, %118, %cst_51 {dimension_numbers = #tpu.dot_dimension_numbers<[1], [0], [0], [1], [0, 0, 1, 1], [], []>} : vector<16x64xf32>, vector<64x32xf32>, vector<16x32xf32> -> vector<16x32xf32>
    %c0_52 = arith.constant 0 : index
    %c0_53 = arith.constant 0 : index
    %120 = vector.load %arg11[%c0_52, %c0_53] : memref<1x32xf32, #tpu.memory_space<vmem>>, vector<1x32xf32>
    %121 = vector.broadcast %120 : vector<1x32xf32> to vector<16x32xf32>
    %122 = arith.addf %119, %121 : vector<16x32xf32>
    %123 = arith.addf %110, %122 : vector<16x32xf32>
    %c0_54 = arith.constant 0 : index
    %c0_55 = arith.constant 0 : index
    %124 = vector.load %arg12[%c0_54, %c0_55] : memref<1x32xf32, #tpu.memory_space<vmem>>, vector<1x32xf32>
    %c0_56 = arith.constant 0 : index
    %c0_57 = arith.constant 0 : index
    %125 = vector.load %arg13[%c0_56, %c0_57] : memref<1x32xf32, #tpu.memory_space<vmem>>, vector<1x32xf32>
    %cst_58 = arith.constant dense<0.000000e+00> : vector<16xf32>
    %126 = vector.multi_reduction <add>, %123, %cst_58 [1] : vector<16x32xf32> to vector<16xf32>
    %127 = vector.shape_cast %126 : vector<16xf32> to vector<16x1xf32>
    %cst_59 = arith.constant 3.200000e+01 : f32
    %128 = vector.broadcast %cst_59 : f32 to vector<16x1xf32>
    %129 = arith.divf %127, %128 : vector<16x1xf32>
    %130 = vector.broadcast %129 : vector<16x1xf32> to vector<16x32xf32>
    %131 = arith.subf %123, %130 : vector<16x32xf32>
    %132 = arith.mulf %131, %131 : vector<16x32xf32>
    %cst_60 = arith.constant dense<0.000000e+00> : vector<16xf32>
    %133 = vector.multi_reduction <add>, %132, %cst_60 [1] : vector<16x32xf32> to vector<16xf32>
    %134 = vector.shape_cast %133 : vector<16xf32> to vector<16x1xf32>
    %cst_61 = arith.constant 3.200000e+01 : f32
    %135 = vector.broadcast %cst_61 : f32 to vector<16x1xf32>
    %136 = arith.divf %134, %135 : vector<16x1xf32>
    %137 = vector.broadcast %129 : vector<16x1xf32> to vector<16x32xf32>
    %138 = arith.subf %123, %137 : vector<16x32xf32>
    %cst_62 = arith.constant 9.99999974E-6 : f32
    %139 = vector.broadcast %cst_62 : f32 to vector<16x1xf32>
    %140 = arith.addf %136, %139 : vector<16x1xf32>
    %141 = math.rsqrt %140 : vector<16x1xf32>
    %142 = vector.broadcast %141 : vector<16x1xf32> to vector<16x32xf32>
    %143 = arith.mulf %138, %142 : vector<16x32xf32>
    %144 = vector.broadcast %124 : vector<1x32xf32> to vector<16x32xf32>
    %145 = arith.mulf %143, %144 : vector<16x32xf32>
    %146 = vector.broadcast %125 : vector<1x32xf32> to vector<16x32xf32>
    %147 = arith.addf %145, %146 : vector<16x32xf32>
    %c0_63 = arith.constant 0 : index
    %c0_64 = arith.constant 0 : index
    %148 = vector.load %arg14[%c0_63, %c0_64] : memref<32x96xf32, #tpu.memory_space<vmem>>, vector<32x96xf32>
    %cst_65 = arith.constant dense<0.000000e+00> : vector<16x96xf32>
    %149 = tpu.matmul %147, %148, %cst_65 {dimension_numbers = #tpu.dot_dimension_numbers<[1], [0], [0], [1], [0, 0, 1, 1], [], []>} : vector<16x32xf32>, vector<32x96xf32>, vector<16x96xf32> -> vector<16x96xf32>
    %c0_66 = arith.constant 0 : index
    %c0_67 = arith.constant 0 : index
    %150 = vector.load %arg15[%c0_66, %c0_67] : memref<1x96xf32, #tpu.memory_space<vmem>>, vector<1x96xf32>
    %151 = vector.broadcast %150 : vector<1x96xf32> to vector<16x96xf32>
    %152 = arith.addf %149, %151 : vector<16x96xf32>
    %153 = vector.shape_cast %152 : vector<16x96xf32> to vector<2x8x96xf32>
    %154 = vector.extract_strided_slice %153 {offsets = [0, 0, 0], sizes = [2, 8, 8], strides = [1, 1, 1]} : vector<2x8x96xf32> to vector<2x8x8xf32>
    %155 = vector.extract_strided_slice %153 {offsets = [0, 0, 32], sizes = [2, 8, 8], strides = [1, 1, 1]} : vector<2x8x96xf32> to vector<2x8x8xf32>
    %156 = vector.extract_strided_slice %153 {offsets = [0, 0, 64], sizes = [2, 8, 8], strides = [1, 1, 1]} : vector<2x8x96xf32> to vector<2x8x8xf32>
    "tpu.trace_start"() <{level = 10 : i32, message = "bqd,bkd->bqk"}> : () -> ()
    %cst_68 = arith.constant dense<0.000000e+00> : vector<2x8x8xf32>
    %157 = tpu.matmul %154, %155, %cst_68 {dimension_numbers = #tpu.dot_dimension_numbers<[2], [2], [1], [1], [0, 0, 0, 1, 1, 1], [0], [0]>} : vector<2x8x8xf32>, vector<2x8x8xf32>, vector<2x8x8xf32> -> vector<2x8x8xf32>
    "tpu.trace_stop"() : () -> ()
    %cst_69 = arith.constant 0.353553385 : f32
    %158 = vector.broadcast %cst_69 : f32 to vector<2x8x8xf32>
    %159 = arith.mulf %157, %158 : vector<2x8x8xf32>
    %cst_70 = arith.constant dense<0xFF800000> : vector<2x8xf32>
    %160 = vector.multi_reduction <maximumf>, %159, %cst_70 [2] : vector<2x8x8xf32> to vector<2x8xf32>
    %161 = vector.shape_cast %160 : vector<2x8xf32> to vector<2x8x1xf32>
    %162 = vector.broadcast %161 : vector<2x8x1xf32> to vector<2x8x8xf32>
    %163 = arith.subf %159, %162 : vector<2x8x8xf32>
    %164 = math.exp %163 : vector<2x8x8xf32>
    %cst_71 = arith.constant dense<0.000000e+00> : vector<2x8xf32>
    %165 = vector.multi_reduction <add>, %164, %cst_71 [2] : vector<2x8x8xf32> to vector<2x8xf32>
    %166 = vector.shape_cast %165 : vector<2x8xf32> to vector<2x8x1xf32>
    %167 = tpu.reciprocal %166 {approx = true} : vector<2x8x1xf32> -> vector<2x8x1xf32>
    %168 = vector.broadcast %167 : vector<2x8x1xf32> to vector<2x8x8xf32>
    %169 = arith.mulf %164, %168 : vector<2x8x8xf32>
    "tpu.trace_start"() <{level = 10 : i32, message = "bqk,bkd->bqd"}> : () -> ()
    %cst_72 = arith.constant dense<0.000000e+00> : vector<2x8x8xf32>
    %170 = tpu.matmul %169, %156, %cst_72 {dimension_numbers = #tpu.dot_dimension_numbers<[2], [1], [1], [2], [0, 0, 0, 1, 1, 2], [0], [0]>} : vector<2x8x8xf32>, vector<2x8x8xf32>, vector<2x8x8xf32> -> vector<2x8x8xf32>
    "tpu.trace_stop"() : () -> ()
    %171 = vector.extract_strided_slice %153 {offsets = [0, 0, 8], sizes = [2, 8, 8], strides = [1, 1, 1]} : vector<2x8x96xf32> to vector<2x8x8xf32>
    %172 = vector.extract_strided_slice %153 {offsets = [0, 0, 40], sizes = [2, 8, 8], strides = [1, 1, 1]} : vector<2x8x96xf32> to vector<2x8x8xf32>
    %173 = vector.extract_strided_slice %153 {offsets = [0, 0, 72], sizes = [2, 8, 8], strides = [1, 1, 1]} : vector<2x8x96xf32> to vector<2x8x8xf32>
    "tpu.trace_start"() <{level = 10 : i32, message = "bqd,bkd->bqk"}> : () -> ()
    %cst_73 = arith.constant dense<0.000000e+00> : vector<2x8x8xf32>
    %174 = tpu.matmul %171, %172, %cst_73 {dimension_numbers = #tpu.dot_dimension_numbers<[2], [2], [1], [1], [0, 0, 0, 1, 1, 1], [0], [0]>} : vector<2x8x8xf32>, vector<2x8x8xf32>, vector<2x8x8xf32> -> vector<2x8x8xf32>
    "tpu.trace_stop"() : () -> ()
    %cst_74 = arith.constant 0.353553385 : f32
    %175 = vector.broadcast %cst_74 : f32 to vector<2x8x8xf32>
    %176 = arith.mulf %174, %175 : vector<2x8x8xf32>
    %cst_75 = arith.constant dense<0xFF800000> : vector<2x8xf32>
    %177 = vector.multi_reduction <maximumf>, %176, %cst_75 [2] : vector<2x8x8xf32> to vector<2x8xf32>
    %178 = vector.shape_cast %177 : vector<2x8xf32> to vector<2x8x1xf32>
    %179 = vector.broadcast %178 : vector<2x8x1xf32> to vector<2x8x8xf32>
    %180 = arith.subf %176, %179 : vector<2x8x8xf32>
    %181 = math.exp %180 : vector<2x8x8xf32>
    %cst_76 = arith.constant dense<0.000000e+00> : vector<2x8xf32>
    %182 = vector.multi_reduction <add>, %181, %cst_76 [2] : vector<2x8x8xf32> to vector<2x8xf32>
    %183 = vector.shape_cast %182 : vector<2x8xf32> to vector<2x8x1xf32>
    %184 = tpu.reciprocal %183 {approx = true} : vector<2x8x1xf32> -> vector<2x8x1xf32>
    %185 = vector.broadcast %184 : vector<2x8x1xf32> to vector<2x8x8xf32>
    %186 = arith.mulf %181, %185 : vector<2x8x8xf32>
    "tpu.trace_start"() <{level = 10 : i32, message = "bqk,bkd->bqd"}> : () -> ()
    %cst_77 = arith.constant dense<0.000000e+00> : vector<2x8x8xf32>
    %187 = tpu.matmul %186, %173, %cst_77 {dimension_numbers = #tpu.dot_dimension_numbers<[2], [1], [1], [2], [0, 0, 0, 1, 1, 2], [0], [0]>} : vector<2x8x8xf32>, vector<2x8x8xf32>, vector<2x8x8xf32> -> vector<2x8x8xf32>
    "tpu.trace_stop"() : () -> ()
    %188 = vector.extract_strided_slice %153 {offsets = [0, 0, 16], sizes = [2, 8, 8], strides = [1, 1, 1]} : vector<2x8x96xf32> to vector<2x8x8xf32>
    %189 = vector.extract_strided_slice %153 {offsets = [0, 0, 48], sizes = [2, 8, 8], strides = [1, 1, 1]} : vector<2x8x96xf32> to vector<2x8x8xf32>
    %190 = vector.extract_strided_slice %153 {offsets = [0, 0, 80], sizes = [2, 8, 8], strides = [1, 1, 1]} : vector<2x8x96xf32> to vector<2x8x8xf32>
    "tpu.trace_start"() <{level = 10 : i32, message = "bqd,bkd->bqk"}> : () -> ()
    %cst_78 = arith.constant dense<0.000000e+00> : vector<2x8x8xf32>
    %191 = tpu.matmul %188, %189, %cst_78 {dimension_numbers = #tpu.dot_dimension_numbers<[2], [2], [1], [1], [0, 0, 0, 1, 1, 1], [0], [0]>} : vector<2x8x8xf32>, vector<2x8x8xf32>, vector<2x8x8xf32> -> vector<2x8x8xf32>
    "tpu.trace_stop"() : () -> ()
    %cst_79 = arith.constant 0.353553385 : f32
    %192 = vector.broadcast %cst_79 : f32 to vector<2x8x8xf32>
    %193 = arith.mulf %191, %192 : vector<2x8x8xf32>
    %cst_80 = arith.constant dense<0xFF800000> : vector<2x8xf32>
    %194 = vector.multi_reduction <maximumf>, %193, %cst_80 [2] : vector<2x8x8xf32> to vector<2x8xf32>
    %195 = vector.shape_cast %194 : vector<2x8xf32> to vector<2x8x1xf32>
    %196 = vector.broadcast %195 : vector<2x8x1xf32> to vector<2x8x8xf32>
    %197 = arith.subf %193, %196 : vector<2x8x8xf32>
    %198 = math.exp %197 : vector<2x8x8xf32>
    %cst_81 = arith.constant dense<0.000000e+00> : vector<2x8xf32>
    %199 = vector.multi_reduction <add>, %198, %cst_81 [2] : vector<2x8x8xf32> to vector<2x8xf32>
    %200 = vector.shape_cast %199 : vector<2x8xf32> to vector<2x8x1xf32>
    %201 = tpu.reciprocal %200 {approx = true} : vector<2x8x1xf32> -> vector<2x8x1xf32>
    %202 = vector.broadcast %201 : vector<2x8x1xf32> to vector<2x8x8xf32>
    %203 = arith.mulf %198, %202 : vector<2x8x8xf32>
    "tpu.trace_start"() <{level = 10 : i32, message = "bqk,bkd->bqd"}> : () -> ()
    %cst_82 = arith.constant dense<0.000000e+00> : vector<2x8x8xf32>
    %204 = tpu.matmul %203, %190, %cst_82 {dimension_numbers = #tpu.dot_dimension_numbers<[2], [1], [1], [2], [0, 0, 0, 1, 1, 2], [0], [0]>} : vector<2x8x8xf32>, vector<2x8x8xf32>, vector<2x8x8xf32> -> vector<2x8x8xf32>
    "tpu.trace_stop"() : () -> ()
    %205 = vector.extract_strided_slice %153 {offsets = [0, 0, 24], sizes = [2, 8, 8], strides = [1, 1, 1]} : vector<2x8x96xf32> to vector<2x8x8xf32>
    %206 = vector.extract_strided_slice %153 {offsets = [0, 0, 56], sizes = [2, 8, 8], strides = [1, 1, 1]} : vector<2x8x96xf32> to vector<2x8x8xf32>
    %207 = vector.extract_strided_slice %153 {offsets = [0, 0, 88], sizes = [2, 8, 8], strides = [1, 1, 1]} : vector<2x8x96xf32> to vector<2x8x8xf32>
    "tpu.trace_start"() <{level = 10 : i32, message = "bqd,bkd->bqk"}> : () -> ()
    %cst_83 = arith.constant dense<0.000000e+00> : vector<2x8x8xf32>
    %208 = tpu.matmul %205, %206, %cst_83 {dimension_numbers = #tpu.dot_dimension_numbers<[2], [2], [1], [1], [0, 0, 0, 1, 1, 1], [0], [0]>} : vector<2x8x8xf32>, vector<2x8x8xf32>, vector<2x8x8xf32> -> vector<2x8x8xf32>
    "tpu.trace_stop"() : () -> ()
    %cst_84 = arith.constant 0.353553385 : f32
    %209 = vector.broadcast %cst_84 : f32 to vector<2x8x8xf32>
    %210 = arith.mulf %208, %209 : vector<2x8x8xf32>
    %cst_85 = arith.constant dense<0xFF800000> : vector<2x8xf32>
    %211 = vector.multi_reduction <maximumf>, %210, %cst_85 [2] : vector<2x8x8xf32> to vector<2x8xf32>
    %212 = vector.shape_cast %211 : vector<2x8xf32> to vector<2x8x1xf32>
    %213 = vector.broadcast %212 : vector<2x8x1xf32> to vector<2x8x8xf32>
    %214 = arith.subf %210, %213 : vector<2x8x8xf32>
    %215 = math.exp %214 : vector<2x8x8xf32>
    %cst_86 = arith.constant dense<0.000000e+00> : vector<2x8xf32>
    %216 = vector.multi_reduction <add>, %215, %cst_86 [2] : vector<2x8x8xf32> to vector<2x8xf32>
    %217 = vector.shape_cast %216 : vector<2x8xf32> to vector<2x8x1xf32>
    %218 = tpu.reciprocal %217 {approx = true} : vector<2x8x1xf32> -> vector<2x8x1xf32>
    %219 = vector.broadcast %218 : vector<2x8x1xf32> to vector<2x8x8xf32>
    %220 = arith.mulf %215, %219 : vector<2x8x8xf32>
    "tpu.trace_start"() <{level = 10 : i32, message = "bqk,bkd->bqd"}> : () -> ()
    %cst_87 = arith.constant dense<0.000000e+00> : vector<2x8x8xf32>
    %221 = tpu.matmul %220, %207, %cst_87 {dimension_numbers = #tpu.dot_dimension_numbers<[2], [1], [1], [2], [0, 0, 0, 1, 1, 2], [0], [0]>} : vector<2x8x8xf32>, vector<2x8x8xf32>, vector<2x8x8xf32> -> vector<2x8x8xf32>
    "tpu.trace_stop"() : () -> ()
    %222 = tpu.concatenate %170, %187, %204, %221 in 2 : vector<2x8x8xf32>, vector<2x8x8xf32>, vector<2x8x8xf32>, vector<2x8x8xf32> -> vector<2x8x32xf32>
    %223 = vector.shape_cast %222 : vector<2x8x32xf32> to vector<16x32xf32>
    %c0_88 = arith.constant 0 : index
    %c0_89 = arith.constant 0 : index
    %224 = vector.load %arg16[%c0_88, %c0_89] : memref<32x32xf32, #tpu.memory_space<vmem>>, vector<32x32xf32>
    %cst_90 = arith.constant dense<0.000000e+00> : vector<16x32xf32>
    %225 = tpu.matmul %223, %224, %cst_90 {dimension_numbers = #tpu.dot_dimension_numbers<[1], [0], [0], [1], [0, 0, 1, 1], [], []>} : vector<16x32xf32>, vector<32x32xf32>, vector<16x32xf32> -> vector<16x32xf32>
    %c0_91 = arith.constant 0 : index
    %c0_92 = arith.constant 0 : index
    %226 = vector.load %arg17[%c0_91, %c0_92] : memref<1x32xf32, #tpu.memory_space<vmem>>, vector<1x32xf32>
    %227 = vector.broadcast %226 : vector<1x32xf32> to vector<16x32xf32>
    %228 = arith.addf %225, %227 : vector<16x32xf32>
    %229 = arith.addf %147, %228 : vector<16x32xf32>
    %c0_93 = arith.constant 0 : index
    %c0_94 = arith.constant 0 : index
    %230 = vector.load %arg18[%c0_93, %c0_94] : memref<1x32xf32, #tpu.memory_space<vmem>>, vector<1x32xf32>
    %c0_95 = arith.constant 0 : index
    %c0_96 = arith.constant 0 : index
    %231 = vector.load %arg19[%c0_95, %c0_96] : memref<1x32xf32, #tpu.memory_space<vmem>>, vector<1x32xf32>
    %cst_97 = arith.constant dense<0.000000e+00> : vector<16xf32>
    %232 = vector.multi_reduction <add>, %229, %cst_97 [1] : vector<16x32xf32> to vector<16xf32>
    %233 = vector.shape_cast %232 : vector<16xf32> to vector<16x1xf32>
    %cst_98 = arith.constant 3.200000e+01 : f32
    %234 = vector.broadcast %cst_98 : f32 to vector<16x1xf32>
    %235 = arith.divf %233, %234 : vector<16x1xf32>
    %236 = vector.broadcast %235 : vector<16x1xf32> to vector<16x32xf32>
    %237 = arith.subf %229, %236 : vector<16x32xf32>
    %238 = arith.mulf %237, %237 : vector<16x32xf32>
    %cst_99 = arith.constant dense<0.000000e+00> : vector<16xf32>
    %239 = vector.multi_reduction <add>, %238, %cst_99 [1] : vector<16x32xf32> to vector<16xf32>
    %240 = vector.shape_cast %239 : vector<16xf32> to vector<16x1xf32>
    %cst_100 = arith.constant 3.200000e+01 : f32
    %241 = vector.broadcast %cst_100 : f32 to vector<16x1xf32>
    %242 = arith.divf %240, %241 : vector<16x1xf32>
    %243 = vector.broadcast %235 : vector<16x1xf32> to vector<16x32xf32>
    %244 = arith.subf %229, %243 : vector<16x32xf32>
    %cst_101 = arith.constant 9.99999974E-6 : f32
    %245 = vector.broadcast %cst_101 : f32 to vector<16x1xf32>
    %246 = arith.addf %242, %245 : vector<16x1xf32>
    %247 = math.rsqrt %246 : vector<16x1xf32>
    %248 = vector.broadcast %247 : vector<16x1xf32> to vector<16x32xf32>
    %249 = arith.mulf %244, %248 : vector<16x32xf32>
    %250 = vector.broadcast %230 : vector<1x32xf32> to vector<16x32xf32>
    %251 = arith.mulf %249, %250 : vector<16x32xf32>
    %252 = vector.broadcast %231 : vector<1x32xf32> to vector<16x32xf32>
    %253 = arith.addf %251, %252 : vector<16x32xf32>
    %c0_102 = arith.constant 0 : index
    %c0_103 = arith.constant 0 : index
    %254 = vector.load %arg20[%c0_102, %c0_103] : memref<32x64xf32, #tpu.memory_space<vmem>>, vector<32x64xf32>
    %cst_104 = arith.constant dense<0.000000e+00> : vector<16x64xf32>
    %255 = tpu.matmul %253, %254, %cst_104 {dimension_numbers = #tpu.dot_dimension_numbers<[1], [0], [0], [1], [0, 0, 1, 1], [], []>} : vector<16x32xf32>, vector<32x64xf32>, vector<16x64xf32> -> vector<16x64xf32>
    %c0_105 = arith.constant 0 : index
    %c0_106 = arith.constant 0 : index
    %256 = vector.load %arg21[%c0_105, %c0_106] : memref<1x64xf32, #tpu.memory_space<vmem>>, vector<1x64xf32>
    %257 = vector.broadcast %256 : vector<1x64xf32> to vector<16x64xf32>
    %258 = arith.addf %255, %257 : vector<16x64xf32>
    %cst_107 = arith.constant 0.000000e+00 : f32
    %259 = vector.broadcast %cst_107 : f32 to vector<16x64xf32>
    %260 = arith.maximumf %258, %259 : vector<16x64xf32>
    %c0_108 = arith.constant 0 : index
    %c0_109 = arith.constant 0 : index
    %261 = vector.load %arg22[%c0_108, %c0_109] : memref<64x32xf32, #tpu.memory_space<vmem>>, vector<64x32xf32>
    %cst_110 = arith.constant dense<0.000000e+00> : vector<16x32xf32>
    %262 = tpu.matmul %260, %261, %cst_110 {dimension_numbers = #tpu.dot_dimension_numbers<[1], [0], [0], [1], [0, 0, 1, 1], [], []>} : vector<16x64xf32>, vector<64x32xf32>, vector<16x32xf32> -> vector<16x32xf32>
    %c0_111 = arith.constant 0 : index
    %c0_112 = arith.constant 0 : index
    %263 = vector.load %arg23[%c0_111, %c0_112] : memref<1x32xf32, #tpu.memory_space<vmem>>, vector<1x32xf32>
    %264 = vector.broadcast %263 : vector<1x32xf32> to vector<16x32xf32>
    %265 = arith.addf %262, %264 : vector<16x32xf32>
    %266 = arith.addf %253, %265 : vector<16x32xf32>
    %c0_113 = arith.constant 0 : index
    %c0_114 = arith.constant 0 : index
    %267 = vector.load %arg24[%c0_113, %c0_114] : memref<1x32xf32, #tpu.memory_space<vmem>>, vector<1x32xf32>
    %c0_115 = arith.constant 0 : index
    %c0_116 = arith.constant 0 : index
    %268 = vector.load %arg25[%c0_115, %c0_116] : memref<1x32xf32, #tpu.memory_space<vmem>>, vector<1x32xf32>
    %cst_117 = arith.constant dense<0.000000e+00> : vector<16xf32>
    %269 = vector.multi_reduction <add>, %266, %cst_117 [1] : vector<16x32xf32> to vector<16xf32>
    %270 = vector.shape_cast %269 : vector<16xf32> to vector<16x1xf32>
    %cst_118 = arith.constant 3.200000e+01 : f32
    %271 = vector.broadcast %cst_118 : f32 to vector<16x1xf32>
    %272 = arith.divf %270, %271 : vector<16x1xf32>
    %273 = vector.broadcast %272 : vector<16x1xf32> to vector<16x32xf32>
    %274 = arith.subf %266, %273 : vector<16x32xf32>
    %275 = arith.mulf %274, %274 : vector<16x32xf32>
    %cst_119 = arith.constant dense<0.000000e+00> : vector<16xf32>
    %276 = vector.multi_reduction <add>, %275, %cst_119 [1] : vector<16x32xf32> to vector<16xf32>
    %277 = vector.shape_cast %276 : vector<16xf32> to vector<16x1xf32>
    %cst_120 = arith.constant 3.200000e+01 : f32
    %278 = vector.broadcast %cst_120 : f32 to vector<16x1xf32>
    %279 = arith.divf %277, %278 : vector<16x1xf32>
    %280 = vector.broadcast %272 : vector<16x1xf32> to vector<16x32xf32>
    %281 = arith.subf %266, %280 : vector<16x32xf32>
    %cst_121 = arith.constant 9.99999974E-6 : f32
    %282 = vector.broadcast %cst_121 : f32 to vector<16x1xf32>
    %283 = arith.addf %279, %282 : vector<16x1xf32>
    %284 = math.rsqrt %283 : vector<16x1xf32>
    %285 = vector.broadcast %284 : vector<16x1xf32> to vector<16x32xf32>
    %286 = arith.mulf %281, %285 : vector<16x32xf32>
    %287 = vector.broadcast %267 : vector<1x32xf32> to vector<16x32xf32>
    %288 = arith.mulf %286, %287 : vector<16x32xf32>
    %289 = vector.broadcast %268 : vector<1x32xf32> to vector<16x32xf32>
    %290 = arith.addf %288, %289 : vector<16x32xf32>
    %291 = vector.shape_cast %290 : vector<16x32xf32> to vector<2x8x32xf32>
    %292 = vector.extract_strided_slice %291 {offsets = [0, 0, 0], sizes = [2, 1, 32], strides = [1, 1, 1]} : vector<2x8x32xf32> to vector<2x1x32xf32>
    %293 = vector.shape_cast %292 : vector<2x1x32xf32> to vector<2x32xf32>
    %294 = vector.extract_strided_slice %291 {offsets = [0, 1, 0], sizes = [2, 1, 32], strides = [1, 1, 1]} : vector<2x8x32xf32> to vector<2x1x32xf32>
    %295 = vector.shape_cast %294 : vector<2x1x32xf32> to vector<2x32xf32>
    %296 = vector.extract_strided_slice %291 {offsets = [0, 2, 0], sizes = [2, 1, 32], strides = [1, 1, 1]} : vector<2x8x32xf32> to vector<2x1x32xf32>
    %297 = vector.shape_cast %296 : vector<2x1x32xf32> to vector<2x32xf32>
    %298 = vector.extract_strided_slice %291 {offsets = [0, 3, 0], sizes = [2, 1, 32], strides = [1, 1, 1]} : vector<2x8x32xf32> to vector<2x1x32xf32>
    %299 = vector.shape_cast %298 : vector<2x1x32xf32> to vector<2x32xf32>
    %300 = vector.extract_strided_slice %291 {offsets = [0, 4, 0], sizes = [2, 1, 32], strides = [1, 1, 1]} : vector<2x8x32xf32> to vector<2x1x32xf32>
    %301 = vector.shape_cast %300 : vector<2x1x32xf32> to vector<2x32xf32>
    %302 = vector.extract_strided_slice %291 {offsets = [0, 5, 0], sizes = [2, 1, 32], strides = [1, 1, 1]} : vector<2x8x32xf32> to vector<2x1x32xf32>
    %303 = vector.shape_cast %302 : vector<2x1x32xf32> to vector<2x32xf32>
    %304 = vector.extract_strided_slice %291 {offsets = [0, 6, 0], sizes = [2, 1, 32], strides = [1, 1, 1]} : vector<2x8x32xf32> to vector<2x1x32xf32>
    %305 = vector.shape_cast %304 : vector<2x1x32xf32> to vector<2x32xf32>
    %306 = vector.extract_strided_slice %291 {offsets = [0, 7, 0], sizes = [2, 1, 32], strides = [1, 1, 1]} : vector<2x8x32xf32> to vector<2x1x32xf32>
    %307 = vector.shape_cast %306 : vector<2x1x32xf32> to vector<2x32xf32>
    %308 = tpu.concatenate %293, %295, %297, %299, %301, %303, %305, %307 in 1 : vector<2x32xf32>, vector<2x32xf32>, vector<2x32xf32>, vector<2x32xf32>, vector<2x32xf32>, vector<2x32xf32>, vector<2x32xf32>, vector<2x32xf32> -> vector<2x256xf32>
    %c0_122 = arith.constant 0 : index
    %c0_123 = arith.constant 0 : index
    %309 = vector.load %arg26[%c0_122, %c0_123] : memref<256x128xf32, #tpu.memory_space<vmem>>, vector<256x128xf32>
    %cst_124 = arith.constant dense<0.000000e+00> : vector<2x128xf32>
    %310 = tpu.matmul %308, %309, %cst_124 {dimension_numbers = #tpu.dot_dimension_numbers<[1], [0], [0], [1], [0, 0, 1, 1], [], []>} : vector<2x256xf32>, vector<256x128xf32>, vector<2x128xf32> -> vector<2x128xf32>
    %c0_125 = arith.constant 0 : index
    %c0_126 = arith.constant 0 : index
    %311 = vector.load %arg27[%c0_125, %c0_126] : memref<1x128xf32, #tpu.memory_space<vmem>>, vector<1x128xf32>
    %312 = vector.broadcast %311 : vector<1x128xf32> to vector<2x128xf32>
    %313 = arith.addf %310, %312 : vector<2x128xf32>
    %c0_127 = arith.constant 0 : index
    %c0_128 = arith.constant 0 : index
    %314 = vector.load %arg28[%c0_127, %c0_128] : memref<2x128xf32, #tpu.memory_space<vmem>>, vector<2x128xf32>
    tpu.vector_store %arg28[%c0_127, %c0_128], %313 {strides = array<i32>} : memref<2x128xf32, #tpu.memory_space<vmem>>, vector<2x128xf32>,
    return
  }
}

</mosaic_0001>

<bundles_post_ra>
// kernel: tpu_custom_call.1
= control target key start
LH: loop header
LB: loop body
LE: loop exit
PB: predicated region body
PF: predicated region fallthrough
CT: control target
= control target key end

     0   :  { %s2969_s0 = inlined_call_operand.hbm [shape: f32[2,8,32], index: 0, kind: input, shape index: {}]   ;;  %s2970_s1 = inlined_call_operand.hbm [shape: f32[1,8,32], index: 1, kind: input, shape index: {}]   ;;  %s2971_s2 = inlined_call_operand.vmem [shape: f32[32,96], index: 2, kind: input, shape index: {}]   ;;  %s2972_s3 = inlined_call_operand.vmem [shape: f32[1,96], index: 3, kind: input, shape index: {}]   ;;  %s2973_s4 = inlined_call_operand.vmem [shape: f32[32,32], index: 4, kind: input, shape index: {}]   ;;  %s2974_s5 = inlined_call_operand.vmem [shape: f32[1,32], index: 5, kind: input, shape index: {}]   ;;  %s2975_s6 = inlined_call_operand.vmem [shape: f32[1,32], index: 6, kind: input, shape index: {}]   ;;  %s2976_s7 = inlined_call_operand.vmem [shape: f32[1,32], index: 7, kind: input, shape index: {}]   ;;  %s2977_s8 = inlined_call_operand.vmem [shape: f32[32,64], index: 8, kind: input, shape index: {}]   ;;  %s2978_s9 = inlined_call_operand.vmem [shape: f32[1,64], index: 9, kind: input, shape index: {}]   ;;  %s2979_s10 = inlined_call_operand.vmem [shape: f32[64,32], index: 10, kind: input, shape index: {}]   ;;  %s2980_s11 = inlined_call_operand.vmem [shape: f32[1,32], index: 11, kind: input, shape index: {}]   ;;  %s2981_s12 = inlined_call_operand.vmem [shape: f32[1,32], index: 12, kind: input, shape index: {}]   ;;  %s2982_s13 = inlined_call_operand.vmem [shape: f32[1,32], index: 13, kind: input, shape index: {}]   ;;  %s2983_s14 = inlined_call_operand.vmem [shape: f32[32,96], index: 14, kind: input, shape index: {}]   ;;  %s2984_s15 = inlined_call_operand.vmem [shape: f32[1,96], index: 15, kind: input, shape index: {}]   ;;  %s2985_s16 = inlined_call_operand.vmem [shape: f32[32,32], index: 16, kind: input, shape index: {}]   ;;  %s2986_s17 = inlined_call_operand.vmem [shape: f32[1,32], index: 17, kind: input, shape index: {}]   ;;  %s2987_s18 = inlined_call_operand.vmem [shape: f32[1,32], index: 18, kind: input, shape index: {}]   ;;  %s2988_s19 = inlined_call_operand.vmem [shape: f32[1,32], index: 19, kind: input, shape index: {}]   ;;  %s2989_s20 = inlined_call_operand.hbm [shape: f32[32,64], index: 20, kind: input, shape index: {}]   ;;  %s2990_s21 = inlined_call_operand.vmem [shape: f32[1,64], index: 21, kind: input, shape index: {}]   ;;  %s2991_s22 = inlined_call_operand.vmem [shape: f32[64,32], index: 22, kind: input, shape index: {}]   ;;  %s2992_s23 = inlined_call_operand.vmem [shape: f32[1,32], index: 23, kind: input, shape index: {}]   ;;  %s2993_s24 = inlined_call_operand.vmem [shape: f32[1,32], index: 24, kind: input, shape index: {}]   ;;  %s2994_s25 = inlined_call_operand.vmem [shape: f32[1,32], index: 25, kind: input, shape index: {}]   ;;  %s2995_s26 = inlined_call_operand.hbm [shape: f32[256,128], index: 26, kind: input, shape index: {}]   ;;  %s2996_s27 = inlined_call_operand.vmem [shape: f32[1,128], index: 27, kind: input, shape index: {}]   ;;  %s2997_s28 = inlined_call_operand.hbm [shape: f32[2,128], index: 28, kind: output, shape index: {}]  }
   0x1   :  { %3011 = sst [smem:[#allocation15_spill]] %s2969_s0 }
   0x2   :  { %3012 = sst [smem:[#allocation16_spill]] %s2970_s1 }
   0x3   :  { %3013 = sst [smem:[#allocation17_spill]] %s2971_s2 }
   0x4   :  { %3014 = sst [smem:[#allocation18_spill]] %s2972_s3 }
   0x5   :  { %3015 = sst [smem:[#allocation19_spill]] %s2973_s4 }
   0x6   :  { %3016 = sst [smem:[#allocation20_spill]] %s2974_s5 }
   0x7   :  { %3017 = sst [smem:[#allocation21_spill]] %s2975_s6 }
   0x8   :  { %3018 = sst [smem:[#allocation22_spill]] %s2976_s7 }
   0x9   :  { %3019 = sst [smem:[#allocation23_spill]] %s2977_s8 }
   0xa   :  { %3020 = sst [smem:[#allocation24_spill]] %s2978_s9 }
   0xb   :  { %3021 = sst [smem:[#allocation25_spill]] %s2979_s10 }
   0xc   :  { %3022 = sst [smem:[#allocation26_spill]] %s2980_s11 }
   0xd   :  { %3023 = sst [smem:[#allocation27_spill]] %s2981_s12 }
   0xe   :  { %3024 = sst [smem:[#allocation28_spill]] %s2997_s28 }
   0xf   :  { %33 = vsyncpa [#allocation3], 0 }
  0x10   :  { %34 = vsyncpa [#allocation6], 0 }
  0x11   :  { %35 = vsyncpa [#allocation9], 0  ;;  %s3025_s9 = sld [smem:[#allocation16_spill]] }
  0x17   :  { %s55_s30 = sshll.u32 %s3025_s9, 4  ;;  %s56_s30 = int_to_ptr.hbm [resolvable:$true] %s55_s30 }
  0x18   :  { %36 = vsyncpa [#allocation4], 0  ;;  %s2311_s3 = smov [#allocation5]   ;;  %s3026_s11 = sld [smem:[#allocation15_spill]] }
  0x19   :  { %s57_s6 = sshll.u32 %s2311_s3, 4  ;;  %s2312_s2 = smov [#allocation2]   ;;  %s58_s6 = int_to_ptr.vmem [resolvable:$true] %s57_s6 }
  0x1a   :  { %60 = dma.hbm_to_vmem [thread:$0]  %s56_s30, 128, %s58_s6, [#allocation6]  }
  0x1b   :  { %s43_s7 = sshll.u32 %s2312_s2, 4  ;;  %s2313_s12 = smov 128   ;;  %s44_s7 = int_to_ptr.vmem [resolvable:$true] %s43_s7 }
  0x1c   :  { %s3004_s1 = smov 8   ;;  %s101_s5 = sshll.u32 %s2989_s20, 4  ;;  %s102_s5 = int_to_ptr.hbm [resolvable:$true] %s101_s5 }
  0x1d   :  { %s2315_s9 = smov [#allocation7]   ;;  %s124_s30 = sshll.u32 %s2995_s26, 4  ;;  %s125_s30 = int_to_ptr.hbm [resolvable:$true] %s124_s30 }
  0x1e   :  { %s41_s29 = sshll.u32 %s3026_s11, 4  ;;  %s103_s3 = sshll.u32 %s2315_s9, 4  ;;  %s42_s29 = int_to_ptr.hbm [resolvable:$true] %s41_s29  ;;  %s104_s3 = int_to_ptr.vmem [resolvable:$true] %s103_s3 }
  0x1f   :  { %49 = dma.hbm_to_vmem [thread:$0]  %s42_s29, 256, %s44_s7, [#allocation3], %s2313_s12, %s2313_s12, %s3004_s1  }
  0x20   :  { %109 = dma.hbm_to_vmem [thread:$0]  %s102_s5, 512, %s104_s3, [#allocation6], %s2313_s12, %s2313_s12, %s3004_s1  }
  0x21   :  { %s2316_s6 = smov [#allocation8]  }
  0x22   :  { %s126_s0 = sshll.u32 %s2316_s6, 4  ;;  %s127_s0 = int_to_ptr.vmem [resolvable:$true] %s126_s0 }
  0x23   :  { %132 = dma.hbm_to_vmem [thread:$0]  %s125_s30, 4096, %s127_s0, [#allocation9], %s2313_s12, %s2313_s12, %s3004_s1  }
  0x24   :  { %2303 = dma.done.wait [#allocation3], 256  }
  0x25   :  { %2304 = vsyncadd [#allocation3], 4294967040 }
  0x26   :  { %2305 = dma.done.wait [#allocation6], 640  }
  0x27   :  { %2306 = vsyncadd [#allocation6], 4294966656 }
  0x28   :  { %2307 = dma.done.wait [#allocation9], 4096  }
  0x29   :  { %2308 = vsyncadd [#allocation9], 4294963200  ;;  %s3027_s29 = sld [smem:[#allocation17_spill]]  ;;  %v151_v2 = vld [vmem:[#allocation2] sm:$0xff]  ;;  %v153_v3 = vld [vmem:[#allocation5] sm:$0xff]  ;;  %vm164_vm0 = vcmask 261120  }
  0x2a   :  { %v2505_v6 = vadd.f32 %v153_v3, %v151_v2  ;;  %v152_v7 = vld [vmem:[#allocation2 + $0x8] sm:$0xff]  ;;  %s3028_s9 = sld [smem:[#allocation18_spill]]  ;;  %s2317_s3 = smov 88   ;;  %vm197_vm1 = vcmask 64512   ;;  %vm747_vm2 = vcmask 130048   ;;  %vm750_vm3 = vcmask 195584  }
  0x2b   :  { %v2509_v8 = vadd.f32 %v153_v3, %v152_v7  ;;  %s2318_s10 = smov 96   ;;  %s2319_s30 = smov 80   ;;  %vm906_vm11 = vcmask 523264  }
  0x2c   :  { %s2320_s6 = smov 120   ;;  %s2321_s0 = smov 72  }
  0x2d   :  { %s2322_s20 = smov 112   ;;  %s2323_s11 = smov 104  }
  0x2e   :  { %s2325_s28 = smov 64   ;;  %s3006_s26 = smov 48  }
  0x2f   :  { %v159_v0 = vld [vmem:[%s3027_s29 + $0x18] sm:$0xff]  ;;  %v158_v1 = vld [vmem:[%s3027_s29 + $0x10] sm:$0xff]  ;;  %v157_v4 = vld [vmem:[%s3027_s29 + $0x8] sm:$0xff]  ;;  %s3003_s2 = smov 40   ;;  %s3007_s7 = smov 16  }
  0x30   :  { %183 = vmatpush.msra.mxu0 %v159_v0  ;;  %v156_v5 = vld [vmem:[%s3027_s29] sm:$0xff]  ;;  %s3002_s29 = smov 56   ;;  %s3009_s12 = smov 24  }
  0x31   :  { %v2084_v9 = vld [vmem:[%s3028_s9] ss:$0 sm:$0xff]  ;;  %s3029_s5 = sld [smem:[#allocation19_spill]] }
  0x32   :  { %184 = vmatpush.msra.mxu0 %v158_v1  ;;  %s3031_s4 = sld [smem:[#allocation23_spill]] }
  0x33   :  { %s3032_s8 = sld [smem:[#allocation25_spill]] }
  0x34   :  { %185 = vmatpush.msra.mxu0 %v157_v4 }
  0x36   :  { %186 = vmatpush.msra.mxu0 %v156_v5 }
  0x37   :  { %1968 = vmatmul.msk.f32.vlgmr.msra.gmra.mxu0 %vm164_vm0, %v2505_v6 }
  0x3f   :  { %1969 = vmatmul.msk.f32.gmra.mxu0 %vm164_vm0, %v2509_v8 }
  0xb4   :  { %v188_v10 = vpop.f32.mrf.mxu0 }
  0xb5   :  { %v2516_v11 = vadd.f32 %v2084_v9, %v188_v10 }
  0xb7   :  { %327 = vrot.lane.b32.xlu2 %v2516_v11, %s2317_s3  ;;  %195 = vrot.lane.b32.xlu0 %v2516_v11, %s2318_s10 }
  0xbc   :  { %v191_v12 = vpop.f32.mrf.mxu0 }
  0xbd   :  { %v2522_v13 = vadd.f32 %v2084_v9, %v191_v12 }
  0xbf   :  { %355 = vrot.lane.b32.xlu1 %v2522_v13, %s2317_s3  ;;  %459 = vrot.lane.b32.xlu2 %v2516_v11, %s2319_s30  ;;  %v2059_v43 = vpack.i.bf16 %v2522_v13, %v2516_v11 }
  0xc0   :  { %223 = vrot.lane.b32.xlu0 %v2522_v13, %s2318_s10 }
  0xc7   :  { %353 = vrot.lane.b32.xlu1 %v2522_v13, %s2320_s6  ;;  %591 = vrot.lane.b32.xlu2 %v2516_v11, %s2321_s0 }
  0xc8   :  { %325 = vrot.lane.b32.xlu0 %v2516_v11, %s2320_s6 }
  0xcf   :  { %457 = vrot.lane.b32.xlu1 %v2516_v11, %s2322_s20  ;;  %485 = vrot.lane.b32.xlu2 %v2522_v13, %s2322_s20 }
  0xd0   :  { %589 = vrot.lane.b32.xlu0 %v2516_v11, %s2323_s11 }
  0xd7   :  { %487 = vrot.lane.b32.xlu1 %v2522_v13, %s2319_s30 }
  0xd8   :  { %619 = vrot.lane.b32.xlu0 %v2522_v13, %s2321_s0 }
  0xdf   :  { %617 = vrot.lane.b32.xlu1 %v2522_v13, %s2323_s11 }
 0x111   :  { %v328_v14 = vpop.permute.xlu2 %327 }
 0x119   :  { %v460_v16 = vpop.permute.xlu2 %459 }
 0x121   :  { %v592_v20 = vpop.permute.xlu2 %591 }
 0x129   :  { %v196_v15 = vpop.permute.xlu0 %195  ;;  %v486_v26 = vpop.permute.xlu2 %485 }
 0x12a   :  { %1970 = vmatpush.xpose.msk.msra.mxu1 %vm197_vm1, %v196_v15 }
 0x12d   :  { %1971 = vmatmul.msk.f32.vlgmr.msra.gmra.mxu1 %vm197_vm1, %v2516_v11 }
 0x12e   :  { %1976 = vmatpush.xpose.msk.msrb.mxu1 %vm197_vm1, %v328_v14 }
 0x131   :  { %v356_v17 = vpop.permute.xlu1 %355 }
 0x132   :  { %v224_v18 = vpop.permute.xlu0 %223  ;;  %1978 = vmatpush.xpose.msk.msra.mxu2 %vm197_vm1, %v356_v17 }
 0x133   :  { %1972 = vmatpush.xpose.msk.msrb.mxu0 %vm197_vm1, %v224_v18 }
 0x136   :  { %1982 = vmatpush.xpose.msk.msrb.mxu2 %vm197_vm1, %v460_v16  ;;  %1973 = vmatmul.msk.f32.vlgmr.msrb.gmra.mxu0 %vm197_vm1, %v2522_v13 }
 0x139   :  { %v354_v19 = vpop.permute.xlu1 %353 }
 0x13a   :  { %v326_v21 = vpop.permute.xlu0 %325  ;;  %1979 = vmatmul.msk.f32.vlgmr.msra.gmra.mxu2 %vm197_vm1, %v354_v19 }
 0x13b   :  { %1977 = vmatmul.msk.f32.vlgmr.msrb.gmra.mxu1 %vm197_vm1, %v326_v21  ;;  %1988 = vmatpush.xpose.msk.msra.mxu2 %vm197_vm1, %v592_v20 }
 0x141   :  { %v458_v22 = vpop.permute.xlu1 %457 }
 0x142   :  { %v590_v23 = vpop.permute.xlu0 %589  ;;  %1983 = vmatmul.msk.f32.vlgmr.msrb.gmra.mxu2 %vm197_vm1, %v458_v22 }
 0x149   :  { %v488_v24 = vpop.permute.xlu1 %487 }
 0x14a   :  { %v620_v25 = vpop.permute.xlu0 %619  ;;  %1984 = vmatpush.xpose.msk.msra.mxu0 %vm197_vm1, %v488_v24  ;;  %1989 = vmatmul.msk.f32.vlgmr.msra.gmra.mxu2 %vm197_vm1, %v590_v23 }
 0x14d   :  { %1985 = vmatmul.msk.f32.vlgmr.msra.gmra.mxu0 %vm197_vm1, %v486_v26 }
 0x14e   :  { %1990 = vmatpush.xpose.msk.msrb.mxu0 %vm197_vm1, %v620_v25 }
 0x151   :  { %v618_v27 = vpop.permute.xlu1 %617 }
 0x155   :  { %1991 = vmatmul.msk.f32.vlgmr.msrb.gmra.mxu0 %vm197_vm1, %v618_v27 }
 0x1aa   :  { %v219_v28 = vpop.f32.mrf.mxu1 }
 0x1ab   :  { %v249_v29 = vmul.f32 0.35355338, %v219_v28 }
 0x1ad   :  { %v251_v30 = vsel %vm197_vm1, %v249_v29, -inf }
 0x1ae   :  { %252 = vmax.xlane.f32.xlu2 %v251_v30 }
 0x1b3   :  { %v246_v31 = vpop.f32.mrf.mxu0 }
 0x1b4   :  { %v250_v32 = vmul.f32 0.35355338, %v246_v31 }
 0x1b6   :  { %v254_v33 = vsel %vm197_vm1, %v250_v32, -inf }
 0x1b7   :  { %255 = vmax.xlane.f32.xlu0 %v254_v33 }
 0x1b8   :  { %v350_v34 = vpop.f32.mrf.mxu1 }
 0x1b9   :  { %v2568_v35 = vmul.f32 0.35355338, %v350_v34 }
 0x1bb   :  { %v383_v36 = vsel %vm197_vm1, %v2568_v35, -inf }
 0x1bc   :  { %384 = vmax.xlane.f32.xlu1 %v383_v36 }
 0x1bd   :  { %v378_v37 = vpop.f32.mrf.mxu2 }
 0x1be   :  { %v382_v38 = vmul.f32 0.35355338, %v378_v37 }
 0x1c0   :  { %v386_v39 = vsel %vm197_vm1, %v382_v38, -inf }
 0x1c1   :  { %387 = vmax.xlane.f32.xlu2 %v386_v39 }
 0x1c5   :  { %v482_v40 = vpop.f32.mrf.mxu2 }
 0x1c6   :  { %v513_v41 = vmul.f32 0.35355338, %v482_v40 }
 0x1c8   :  { %v515_v42 = vsel %vm197_vm1, %v513_v41, -inf }
 0x1c9   :  { %516 = vmax.xlane.f32.xlu2 %v515_v42 }
 0x1ca   :  { %v510_v44 = vpop.f32.mrf.mxu0 }
 0x1cb   :  { %v514_v45 = vmul.f32 0.35355338, %v510_v44  ;;  %2060 = vrot.lane.b32.xlu0 %v2059_v43, %s3002_s29 }
 0x1cd   :  { %v518_v46 = vsel %vm197_vm1, %v514_v45, -inf  ;;  %v614_v47 = vpop.f32.mrf.mxu2 }
 0x1ce   :  { %519 = vmax.xlane.f32.xlu1 %v518_v46  ;;  %v645_v48 = vmul.f32 0.35355338, %v614_v47 }
 0x1d0   :  { %v647_v49 = vsel %vm197_vm1, %v645_v48, -inf }
 0x1d2   :  { %v642_v50 = vpop.f32.mrf.mxu0 }
 0x1d3   :  { %v2580_v51 = vmul.f32 0.35355338, %v642_v50 }
 0x1d5   :  { %v650_v52 = vsel %vm197_vm1, %v2580_v51, -inf }
 0x1e1   :  { %2055 = vrot.lane.b32.xlu2 %v2059_v43, %s2325_s28 }
 0x1f5   :  { %648 = vmax.xlane.f32.xlu0 %v647_v49 }
 0x20a   :  { %651 = vmax.xlane.f32.xlu2 %v650_v52 }
 0x221   :  { %v253_v53 = vpop.xlane.xlu2 %252 }
 0x222   :  { %v257_v54 = vsub.f32 %v249_v29, %v253_v53  ;;  %537 = vrot.lane.b32.xlu2 %v2516_v11, %s3006_s26 }
 0x224   :  { %v259_v55 = vmul.f32 1.442695, %v257_v54 }
 0x226   :  { %2101 = vpow2.f32 %v259_v55 }
 0x22a   :  { %v256_v56 = vpop.xlane.xlu0 %255 }
 0x22b   :  { %v258_v57 = vsub.f32 %v250_v32, %v256_v56 }
 0x22c   :  { %v2586_v58 = vpop.eup %2101 }
 0x22d   :  { %v261_v59 = vmul.f32 1.442695, %v258_v57  ;;  %v263_v60 = vsel %vm197_vm1, %v2586_v58, 0.0 }
 0x22e   :  { %264 = vadd.xlane.f32.xlu0 %v263_v60 }
 0x22f   :  { %2103 = vpow2.f32 %v261_v59  ;;  %v385_v2 = vpop.xlane.xlu1 %384 }
 0x234   :  { %v388_v61 = vpop.xlane.xlu2 %387 }
 0x235   :  { %v2590_v62 = vpop.eup %2103  ;;  %v390_v63 = vsub.f32 %v382_v38, %v388_v61 }
 0x236   :  { %v266_v0 = vsel %vm197_vm1, %v2590_v62, 0.0 }
 0x237   :  { %v393_v1 = vmul.f32 1.442695, %v390_v63  ;;  %267 = vadd.xlane.f32.xlu1 %v266_v0 }
 0x239   :  { %2105 = vpow2.f32 %v393_v1 }
 0x23c   :  { %v517_v3 = vpop.xlane.xlu2 %516 }
 0x23d   :  { %v2061_v4 = vpop.permute.xlu0 %2060  ;;  %v521_v14 = vsub.f32 %v513_v41, %v517_v3 }
 0x23e   :  { %v2063_v5 = vunpack.i.h.bf16 %v2061_v4  ;;  %v2062_v40 = vunpack.i.l.bf16 %v2061_v4 }
 0x23f   :  { %v2594_v7 = vpop.eup %2105  ;;  %v523_v19 = vmul.f32 1.442695, %v521_v14  ;;  %v755_v14 = vld [vmem:[%s3029_s5 + $0x10] sm:$0xff] }
 0x240   :  { %452 = vmatpush.msra.mxu1 %v2063_v5  ;;  %v398_v9 = vsel %vm197_vm1, %v2594_v7, 0.0 }
 0x241   :  { %v520_v10 = vpop.xlane.xlu1 %519  ;;  %399 = vadd.xlane.f32.xlu1 %v398_v9 }
 0x242   :  { %v522_v12 = vsub.f32 %v514_v45, %v520_v10  ;;  %669 = vrot.lane.b32.xlu0 %v2516_v11, %s3003_s2  ;;  %v389_v11 = vsub.f32 %v2568_v35, %v385_v2 }
 0x244   :  { %v525_v15 = vmul.f32 1.442695, %v522_v12  ;;  %v2056_v16 = vpop.permute.xlu2 %2055  ;;  %v391_v24 = vmul.f32 1.442695, %v389_v11  ;;  %v756_v12 = vld [vmem:[%s3029_s5 + $0x18] sm:$0xff] }
 0x245   :  { %v2057_v17 = vunpack.i.l.bf16 %v2056_v16  ;;  %v2058_v18 = vunpack.i.h.bf16 %v2056_v16  ;;  %779 = vmatpush.msrb.mxu2 %v756_v12  ;;  %v753_v16 = vld [vmem:[%s3029_s5] sm:$0xff] }
 0x246   :  { %2107 = vpow2.f32 %v525_v15  ;;  %v754_v15 = vld [vmem:[%s3029_s5 + $0x8] sm:$0xff]  ;;  %s3033_s5 = sld [smem:[#allocation21_spill]] }
 0x247   :  { %294 = vmatpush.msra.mxu3 %v2057_v17  ;;  %2109 = vpow2.f32 %v523_v19  ;;  %780 = vmatpush.msrb.mxu2 %v755_v14 }
 0x248   :  { %2111 = vpow2.f32 %v391_v24 }
 0x249   :  { %320 = vmatpush.msrb.mxu3 %v2058_v18  ;;  %781 = vmatpush.msrb.mxu2 %v754_v15 }
 0x24b   :  { %782 = vmatpush.msrb.mxu2 %v753_v16 }
 0x24c   :  { %v2600_v20 = vpop.eup %2107 }
 0x24d   :  { %v530_v21 = vsel %vm197_vm1, %v2600_v20, 0.0  ;;  %v2110_v22 = vpop.eup %2109 }
 0x24e   :  { %531 = vadd.xlane.f32.xlu1 %v530_v21  ;;  %v527_v23 = vsel %vm197_vm1, %v2110_v22, 0.0  ;;  %v2112_v25 = vpop.eup %2111 }
 0x24f   :  { %v395_v29 = vsel %vm197_vm1, %v2112_v25, 0.0 }
 0x256   :  { %528 = vadd.xlane.f32.xlu1 %v527_v23 }
 0x268   :  { %v649_v26 = vpop.xlane.xlu0 %648 }
 0x269   :  { %v653_v27 = vsub.f32 %v645_v48, %v649_v26 }
 0x26b   :  { %v655_v28 = vmul.f32 1.442695, %v653_v27 }
 0x26c   :  { %396 = vadd.xlane.f32.xlu0 %v395_v29 }
 0x26d   :  { %2113 = vpow2.f32 %v655_v28 }
 0x273   :  { %v2114_v30 = vpop.eup %2113 }
 0x274   :  { %v659_v31 = vsel %vm197_vm1, %v2114_v30, 0.0 }
 0x275   :  { %660 = vadd.xlane.f32.xlu1 %v659_v31 }
 0x27d   :  { %v652_v32 = vpop.xlane.xlu2 %651 }
 0x27e   :  { %v654_v33 = vsub.f32 %v2580_v51, %v652_v32 }
 0x280   :  { %v657_v34 = vmul.f32 1.442695, %v654_v33  ;;  %695 = vrot.lane.b32.xlu0 %v2522_v13, %s3003_s2 }
 0x282   :  { %2115 = vpow2.f32 %v657_v34 }
 0x285   :  { %v538_v44 = vpop.permute.xlu2 %537 }
 0x288   :  { %v2116_v35 = vpop.eup %2115 }
 0x289   :  { %v662_v36 = vsel %vm197_vm1, %v2116_v35, 0.0 }
 0x28a   :  { %663 = vadd.xlane.f32.xlu2 %v662_v36 }
 0x28e   :  { %563 = vrot.lane.b32.xlu1 %v2522_v13, %s3006_s26  ;;  %s3030_s26 = sld [smem:[#allocation20_spill]] }
 0x294   :  { %v2085_v28 = vld [vmem:[%s3030_s26] ss:$0 sm:$0xff] }
 0x2a1   :  { %v265_v37 = vpop.xlane.xlu0 %264 }
 0x2a2   :  { %2117 = vrcp.f32 %v265_v37  ;;  %v2330_v37 = vmov 32.0  }
 0x2a8   :  { %v2118_v38 = vpop.eup %2117 }
 0x2a9   :  { %v271_v39 = vmul.f32 %v2118_v38, %v2586_v58 }
 0x2aa   :  { %v268_v41 = vpop.xlane.xlu1 %267 }
 0x2ab   :  { %2119 = vrcp.f32 %v268_v41  ;;  %1974 = vmatmul.msk.f32.vlgmr.msra.gmra.mxu3 %vm197_vm1, %v271_v39 }
 0x2ac   :  { %426 = vmatpush.msra.mxu3 %v2062_v40 }
 0x2b1   :  { %v2120_v42 = vpop.eup %2119 }
 0x2b2   :  { %v272_v43 = vmul.f32 %v2120_v42, %v2590_v62 }
 0x2b4   :  { %1975 = vmatmul.msk.f32.vlgmr.msrb.gmra.mxu3 %vm197_vm1, %v272_v43  ;;  %v400_v45 = vpop.xlane.xlu1 %399  ;;  %v670_v47 = vpop.permute.xlu0 %669 }
 0x2b5   :  { %558 = vmatpush.msrb.mxu3 %v538_v44  ;;  %2121 = vrcp.f32 %v400_v45 }
 0x2bb   :  { %v2122_v13 = vpop.eup %2121 }
 0x2bc   :  { %v404_v46 = vmul.f32 %v2122_v13, %v2594_v7 }
 0x2be   :  { %1981 = vmatmul.msk.f32.vlgmr.msra.gmra.mxu1 %vm197_vm1, %v404_v46 }
 0x2c1   :  { %v532_v48 = vpop.xlane.xlu1 %531 }
 0x2c9   :  { %v529_v50 = vpop.xlane.xlu1 %528 }
 0x2df   :  { %v397_v49 = vpop.xlane.xlu0 %396 }
 0x2e0   :  { %2123 = vrcp.f32 %v397_v49 }
 0x2e1   :  { %2125 = vrcp.f32 %v529_v50 }
 0x2e6   :  { %v2124_v51 = vpop.eup %2123 }
 0x2e7   :  { %v403_v52 = vmul.f32 %v2124_v51, %v2112_v25  ;;  %v2126_v54 = vpop.eup %2125  ;;  %v858_v51 = vld [vmem:[%s3031_s4 + $0x18] sm:$0xff] }
 0x2e8   :  { %v661_v53 = vpop.xlane.xlu1 %660  ;;  %v535_v55 = vmul.f32 %v2126_v54, %v2110_v22  ;;  %v855_v54 = vld [vmem:[%s3031_s4] sm:$0xff] }
 0x2e9   :  { %1980 = vmatmul.msk.f32.vlgmr.msra.gmra.mxu3 %vm197_vm1, %v403_v52  ;;  %2127 = vrcp.f32 %v661_v53  ;;  %v857_v52 = vld [vmem:[%s3031_s4 + $0x10] sm:$0xff]  ;;  %v856_v53 = vld [vmem:[%s3031_s4 + $0x8] sm:$0xff]  ;;  %s3034_s4 = sld [smem:[#allocation22_spill]] }
 0x2ea   :  { %690 = vmatpush.msra.mxu3 %v670_v47  ;;  %2129 = vrcp.f32 %v532_v48 }
 0x2ef   :  { %v2128_v56 = vpop.eup %2127 }
 0x2f0   :  { %v667_v57 = vmul.f32 %v2128_v56, %v2114_v30  ;;  %v2130_v58 = vpop.eup %2129 }
 0x2f1   :  { %1986 = vmatmul.msk.f32.vlgmr.msrb.gmra.mxu3 %vm197_vm1, %v535_v55  ;;  %v536_v60 = vmul.f32 %v2130_v58, %v2600_v20  ;;  %v901_v58 = vld [vmem:[%s3032_s8 + $0x38] sm:$0xff] }
 0x2f2   :  { %v696_v62 = vpop.permute.xlu0 %695  ;;  %881 = vmatpush.msrb.mxu3 %v858_v51 }
 0x2f4   :  { %882 = vmatpush.msrb.mxu3 %v857_v52 }
 0x2f6   :  { %883 = vmatpush.msrb.mxu3 %v856_v53 }
 0x2f8   :  { %884 = vmatpush.msrb.mxu3 %v855_v54  ;;  %v997_v54 = vld [vmem:[%s2983_s14 + $0x18] sm:$0xff] }
 0x2f9   :  { %1992 = vmatmul.msk.f32.vlgmr.msra.gmra.mxu3 %vm197_vm1, %v667_v57 }
 0x2fa   :  { %921 = vmatpush.msra.mxu3 %v901_v58 }
 0x2fd   :  { %v664_v59 = vpop.xlane.xlu2 %663 }
 0x2fe   :  { %2131 = vrcp.f32 %v664_v59  ;;  %v900_v59 = vld [vmem:[%s3032_s8 + $0x30] sm:$0xff] }
 0x2ff   :  { %2133 = vrcp.f32 %v2330_v37  ;;  %922 = vmatpush.msra.mxu3 %v900_v59 }
 0x300   :  { %v564_v61 = vpop.permute.xlu1 %563 }
 0x301   :  { %584 = vmatpush.msrb.mxu1 %v564_v61 }
 0x302   :  { %1987 = vmatmul.msk.f32.vlgmr.msrb.gmra.mxu1 %vm197_vm1, %v536_v60  ;;  %v899_v60 = vld [vmem:[%s3032_s8 + $0x28] sm:$0xff] }
 0x303   :  { %716 = vmatpush.msra.mxu1 %v696_v62  ;;  %923 = vmatpush.msra.mxu3 %v899_v60 }
 0x304   :  { %v2132_v63 = vpop.eup %2131 }
 0x305   :  { %v668_v0 = vmul.f32 %v2132_v63, %v2116_v35  ;;  %v2134_v38 = vpop.eup %2133  ;;  %1020 = vmatpush.msrb.mxu1 %v997_v54 }
 0x306   :  { %v801_v39 = vmul.f32 32.0, %v2134_v38  ;;  %vm805_vm4 = vweird.f32 %v2134_v38 }
 0x308   :  { %v802_v40 = vsub.f32 1.0, %v801_v39 }
 0x30a   :  { %1993 = vmatmul.msk.f32.vlgmr.msra.gmra.mxu1 %vm197_vm1, %v668_v0  ;;  %v803_v41 = vmul.f32 %v2134_v38, %v802_v40 }
 0x30c   :  { %v804_v42 = vadd.f32 %v2134_v38, %v803_v41 }
 0x30e   :  { %v2659_v43 = vsel %vm805_vm4, %v2134_v38, %v804_v42 }
 0x32e   :  { %v296_v1 = vpop.f32.mrf.mxu3 }
 0x337   :  { %v322_v2 = vpop.f32.mrf.mxu3 }
 0x33b   :  { %v454_v5 = vpop.f32.mrf.mxu1 }
 0x36c   :  { %v428_v3 = vpop.f32.mrf.mxu3 }
 0x36d   :  { %723 = vrot.lane.b32.xlu0 %v428_v3, %s3004_s1 }
 0x374   :  { %v560_v4 = vpop.f32.mrf.mxu3 }
 0x375   :  { %731 = vrot.lane.b32.xlu0 %v560_v4, %s3007_s7  ;;  %v897_v4 = vld [vmem:[%s3032_s8 + $0x18] sm:$0xff] }
 0x37c   :  { %v692_v7 = vpop.f32.mrf.mxu3 }
 0x37d   :  { %725 = vrot.lane.b32.xlu0 %v454_v5, %s3004_s1  ;;  %739 = vrot.lane.b32.xlu1 %v692_v7, %s3009_s12 }
 0x37f   :  { %v586_v9 = vpop.f32.mrf.mxu1 }
 0x385   :  { %733 = vrot.lane.b32.xlu1 %v586_v9, %s3007_s7 }
 0x387   :  { %v718_v10 = vpop.f32.mrf.mxu1 }
 0x388   :  { %741 = vrot.lane.b32.xlu0 %v718_v10, %s3009_s12  ;;  %v2086_v10 = vld [vmem:[%s3033_s5] ss:$0 sm:$0xff] }
 0x3df   :  { %v724_v17 = vpop.permute.xlu0 %723 }
 0x3e0   :  { %v745_v19 = vsel %vm197_vm1, %v296_v1, %v724_v17  ;;  %v898_v1 = vld [vmem:[%s3032_s8 + $0x20] sm:$0xff] }
 0x3e1   :  { %924 = vmatpush.msra.mxu3 %v898_v1  ;;  %v2087_v17 = vld [vmem:[%s3034_s4] ss:$0 sm:$0xff]  ;;  %s3035_s4 = sld [smem:[#allocation24_spill]] }
 0x3e3   :  { %925 = vmatpush.msra.mxu3 %v897_v4 }
 0x3e7   :  { %v732_v18 = vpop.permute.xlu0 %731 }
 0x3e8   :  { %v748_v20 = vsel %vm747_vm2, %v745_v19, %v732_v18 }
 0x3ef   :  { %v740_v21 = vpop.permute.xlu1 %739  ;;  %v726_v23 = vpop.permute.xlu0 %725 }
 0x3f0   :  { %v751_v22 = vsel %vm750_vm3, %v748_v20, %v740_v21  ;;  %v746_v11 = vsel %vm197_vm1, %v322_v2, %v726_v23 }
 0x3f1   :  { %1994 = vmatmul.msk.f32.vlgmr.msrb.gmra.mxu2 %vm164_vm0, %v751_v22 }
 0x3f7   :  { %v734_v24 = vpop.permute.xlu1 %733 }
 0x3f8   :  { %v749_v25 = vsel %vm747_vm2, %v746_v11, %v734_v24 }
 0x3fa   :  { %v742_v26 = vpop.permute.xlu0 %741 }
 0x3fb   :  { %v752_v27 = vsel %vm750_vm3, %v749_v25, %v742_v26 }
 0x3fc   :  { %1995 = vmatmul.msk.f32.gmra.mxu2 %vm164_vm0, %v752_v27  ;;  %v896_v27 = vld [vmem:[%s3032_s8 + $0x10] sm:$0xff] }
 0x3fd   :  { %926 = vmatpush.msra.mxu3 %v896_v27 }
 0x474   :  { %v784_v29 = vpop.f32.mrf.mxu2 }
 0x475   :  { %v785_v30 = vadd.f32 %v2085_v28, %v784_v29  ;;  %v894_v29 = vld [vmem:[%s3032_s8] sm:$0xff] }
 0x477   :  { %v790_v31 = vadd.f32 %v785_v30, %v2505_v6  ;;  %v2088_v30 = vld [vmem:[%s3035_s4] ss:$0 sm:$0xff] }
 0x479   :  { %v794_v32 = vsel %vm164_vm0, %v790_v31, 0.0 }
 0x47a   :  { %795 = vadd.xlane.f32.xlu2 %v794_v32 }
 0x47f   :  { %v787_v33 = vpop.f32.mrf.mxu2 }
 0x480   :  { %v788_v34 = vadd.f32 %v2085_v28, %v787_v33  ;;  %v895_v28 = vld [vmem:[%s3032_s8 + $0x8] sm:$0xff]  ;;  %s3036_s8 = sld [smem:[#allocation26_spill]] }
 0x481   :  { %927 = vmatpush.msra.mxu3 %v895_v28 }
 0x482   :  { %v791_v35 = vadd.f32 %v788_v34, %v2509_v8 }
 0x483   :  { %928 = vmatpush.msra.mxu3 %v894_v29 }
 0x484   :  { %v797_v36 = vsel %vm164_vm0, %v791_v35, 0.0 }
 0x485   :  { %798 = vadd.xlane.f32.xlu1 %v797_v36 }
 0x486   :  { %v2089_v37 = vld [vmem:[%s3036_s8] ss:$0 sm:$0xff]  ;;  %s3037_s8 = sld [smem:[#allocation27_spill]] }
 0x4ed   :  { %v796_v6 = vpop.xlane.xlu2 %795 }
 0x4ee   :  { %v807_v44 = vmul.f32 %v2659_v43, %v796_v6 }
 0x4f0   :  { %v809_v45 = vsub.f32 %v790_v31, %v807_v44 }
 0x4f2   :  { %v811_v13 = vmul.f32 %v809_v45, %v809_v45 }
 0x4f4   :  { %v813_v8 = vsel %vm164_vm0, %v811_v13, 0.0 }
 0x4f5   :  { %814 = vadd.xlane.f32.xlu0 %v813_v8 }
 0x4f8   :  { %v799_v46 = vpop.xlane.xlu1 %798 }
 0x4f9   :  { %v808_v47 = vmul.f32 %v2659_v43, %v799_v46 }
 0x4fb   :  { %v810_v48 = vsub.f32 %v791_v35, %v808_v47 }
 0x4fd   :  { %v812_v49 = vmul.f32 %v810_v48, %v810_v48 }
 0x4ff   :  { %v816_v50 = vsel %vm164_vm0, %v812_v49, 0.0 }
 0x500   :  { %817 = vadd.xlane.f32.xlu2 %v816_v50 }
 0x568   :  { %v815_v55 = vpop.xlane.xlu0 %814 }
 0x569   :  { %v819_v56 = vmul.f32 %v815_v55, %v2659_v43  ;;  %v996_v55 = vld [vmem:[%s2983_s14 + $0x10] sm:$0xff] }
 0x56a   :  { %1021 = vmatpush.msrb.mxu1 %v996_v55 }
 0x56b   :  { %v821_v57 = vadd.f32 1e-05, %v819_v56  ;;  %v995_v56 = vld [vmem:[%s2983_s14 + $0x8] sm:$0xff] }
 0x56c   :  { %1022 = vmatpush.msrb.mxu1 %v995_v56 }
 0x56d   :  { %2135 = vrsqrt.f32 %v821_v57  ;;  %vm829_vm6 = vweird.f32 %v821_v57 }
 0x573   :  { %v2136_v61 = vpop.eup %2135  ;;  %v818_v62 = vpop.xlane.xlu2 %817 }
 0x574   :  { %v824_v63 = vmul.f32 %v2136_v61, %v821_v57  ;;  %v820_v0 = vmul.f32 %v818_v62, %v2659_v43  ;;  %vm830_vm5 = vweird.f32 %v2136_v61  ;;  %v994_v57 = vld [vmem:[%s2983_s14] sm:$0xff] }
 0x575   :  { %vm831_vm7 = vmor %vm829_vm6, %vm830_vm5  ;;  %1023 = vmatpush.msrb.mxu1 %v994_v57 }
 0x576   :  { %v825_v2 = vmul.f32 %v2136_v61, %v824_v63  ;;  %v822_v3 = vadd.f32 1e-05, %v820_v0 }
 0x578   :  { %v826_v5 = vmul.f32 0.5, %v825_v2  ;;  %2137 = vrsqrt.f32 %v822_v3  ;;  %vm839_vm9 = vweird.f32 %v822_v3 }
 0x57a   :  { %v827_v7 = vsub.f32 1.5, %v826_v5 }
 0x57c   :  { %v828_v9 = vmul.f32 %v2136_v61, %v827_v7  ;;  %v2090_v7 = vld [vmem:[%s3037_s8] ss:$0 sm:$0xff] }
 0x57e   :  { %v2138_v12 = vpop.eup %2137  ;;  %v832_v14 = vsel %vm831_vm7, %v2136_v61, %v828_v9 }
 0x57f   :  { %v843_v15 = vmul.f32 %v832_v14, %v809_v45  ;;  %v834_v16 = vmul.f32 %v2138_v12, %v822_v3  ;;  %vm840_vm8 = vweird.f32 %v2138_v12 }
 0x580   :  { %vm841_vm10 = vmor %vm839_vm9, %vm840_vm8 }
 0x581   :  { %v848_v18 = vmul.f32 %v2086_v10, %v843_v15  ;;  %v835_v19 = vmul.f32 %v2138_v12, %v834_v16  ;;  %v2091_v15 = vld [vmem:[%s2982_s13] ss:$0 sm:$0xff] }
 0x583   :  { %v836_v20 = vmul.f32 0.5, %v835_v19  ;;  %v853_v21 = vadd.f32 %v2087_v17, %v848_v18 }
 0x585   :  { %v837_v22 = vsub.f32 1.5, %v836_v20  ;;  %1996 = vmatmul.msk.f32.vlgmr.msrb.gmra.mxu3 %vm164_vm0, %v853_v21 }
 0x587   :  { %v838_v23 = vmul.f32 %v2138_v12, %v837_v22 }
 0x589   :  { %v842_v11 = vsel %vm841_vm10, %v2138_v12, %v838_v23 }
 0x58a   :  { %v844_v24 = vmul.f32 %v842_v11, %v810_v48 }
 0x58c   :  { %v849_v25 = vmul.f32 %v2086_v10, %v844_v24 }
 0x58e   :  { %v854_v26 = vadd.f32 %v2087_v17, %v849_v25  ;;  %v2092_v25 = vld [vmem:[%s2984_s15] ss:$0 sm:$0xff]  ;;  %s3038_s15 = smov 48  }
 0x590   :  { %1997 = vmatmul.msk.f32.gmra.mxu3 %vm164_vm0, %v854_v26 }
 0x608   :  { %v886_v31 = vpop.f32.mrf.mxu3 }
 0x609   :  { %v887_v32 = vadd.f32 %v2088_v30, %v886_v31 }
 0x60b   :  { %v892_v33 = vmax.f32 %v887_v32, 0.0 }
 0x60d   :  { %1998 = vmatmul.msk.f32.vlgmr.msra.gmra.mxu3 %vm906_vm11, %v892_v33 }
 0x613   :  { %v889_v34 = vpop.f32.mrf.mxu3 }
 0x614   :  { %v890_v35 = vadd.f32 %v2088_v30, %v889_v34 }
 0x616   :  { %v893_v36 = vmax.f32 %v890_v35, 0.0 }
 0x618   :  { %1999 = vmatmul.msk.f32.gmra.mxu3 %vm906_vm11, %v893_v36 }
 0x690   :  { %v930_v38 = vpop.f32.mrf.mxu3 }
 0x691   :  { %v931_v39 = vadd.f32 %v2089_v37, %v930_v38 }
 0x693   :  { %v936_v40 = vadd.f32 %v931_v39, %v853_v21 }
 0x695   :  { %v940_v41 = vsel %vm164_vm0, %v936_v40, 0.0 }
 0x696   :  { %941 = vadd.xlane.f32.xlu2 %v940_v41 }
 0x69b   :  { %v933_v42 = vpop.f32.mrf.mxu3 }
 0x69c   :  { %v934_v6 = vadd.f32 %v2089_v37, %v933_v42 }
 0x69e   :  { %v937_v44 = vadd.f32 %v934_v6, %v854_v26 }
 0x6a0   :  { %v943_v45 = vsel %vm164_vm0, %v937_v44, 0.0 }
 0x6a1   :  { %944 = vadd.xlane.f32.xlu2 %v943_v45 }
 0x709   :  { %v942_v13 = vpop.xlane.xlu2 %941 }
 0x70a   :  { %v946_v8 = vmul.f32 %v942_v13, %v2659_v43 }
 0x70c   :  { %v948_v46 = vsub.f32 %v936_v40, %v946_v8 }
 0x70e   :  { %v950_v47 = vmul.f32 %v948_v46, %v948_v46 }
 0x710   :  { %v952_v48 = vsel %vm164_vm0, %v950_v47, 0.0 }
 0x711   :  { %953 = vadd.xlane.f32.xlu2 %v952_v48 }
 0x714   :  { %v945_v49 = vpop.xlane.xlu2 %944 }
 0x715   :  { %v947_v50 = vmul.f32 %v945_v49, %v2659_v43 }
 0x717   :  { %v949_v51 = vsub.f32 %v937_v44, %v947_v50 }
 0x719   :  { %v951_v52 = vmul.f32 %v949_v51, %v949_v51 }
 0x71b   :  { %v955_v53 = vsel %vm164_vm0, %v951_v52, 0.0 }
 0x71c   :  { %956 = vadd.xlane.f32.xlu2 %v955_v53 }
 0x784   :  { %v954_v58 = vpop.xlane.xlu2 %953 }
 0x785   :  { %v958_v59 = vmul.f32 %v954_v58, %v2659_v43 }
 0x787   :  { %v960_v60 = vadd.f32 1e-05, %v958_v59 }
 0x789   :  { %2139 = vrsqrt.f32 %v960_v60  ;;  %vm968_vm13 = vweird.f32 %v960_v60 }
 0x78f   :  { %v2140_v61 = vpop.eup %2139  ;;  %v957_v62 = vpop.xlane.xlu2 %956 }
 0x790   :  { %v963_v63 = vmul.f32 %v2140_v61, %v960_v60  ;;  %v959_v0 = vmul.f32 %v957_v62, %v2659_v43  ;;  %vm969_vm12 = vweird.f32 %v2140_v61 }
 0x791   :  { %vm970_vm14 = vmor %vm968_vm13, %vm969_vm12 }
 0x792   :  { %v964_v1 = vmul.f32 %v2140_v61, %v963_v63  ;;  %v961_v2 = vadd.f32 1e-05, %v959_v0 }
 0x794   :  { %v965_v3 = vmul.f32 0.5, %v964_v1  ;;  %2141 = vrsqrt.f32 %v961_v2  ;;  %vm978_vm4 = vweird.f32 %v961_v2 }
 0x796   :  { %v966_v4 = vsub.f32 1.5, %v965_v3 }
 0x798   :  { %v967_v5 = vmul.f32 %v2140_v61, %v966_v4 }
 0x79a   :  { %v2142_v9 = vpop.eup %2141  ;;  %v971_v10 = vsel %vm970_vm14, %v2140_v61, %v967_v5 }
 0x79b   :  { %v982_v12 = vmul.f32 %v971_v10, %v948_v46  ;;  %v973_v14 = vmul.f32 %v2142_v9, %v961_v2  ;;  %vm979_vm15 = vweird.f32 %v2142_v9 }
 0x79c   :  { %vm980_vm5 = vmor %vm978_vm4, %vm979_vm15  ;;  %vm1823_vm4 = vcmask 1041409  }
 0x79d   :  { %v987_v16 = vmul.f32 %v2090_v7, %v982_v12  ;;  %v974_v17 = vmul.f32 %v2142_v9, %v973_v14 }
 0x79f   :  { %v975_v18 = vmul.f32 0.5, %v974_v17  ;;  %v2745_v19 = vadd.f32 %v2091_v15, %v987_v16 }
 0x7a1   :  { %v976_v20 = vsub.f32 1.5, %v975_v18  ;;  %2000 = vmatmul.msk.f32.vlgmr.msrb.gmra.mxu1 %vm164_vm0, %v2745_v19 }
 0x7a3   :  { %v977_v21 = vmul.f32 %v2142_v9, %v976_v20 }
 0x7a5   :  { %v981_v22 = vsel %vm980_vm5, %v2142_v9, %v977_v21  ;;  %vm1867_vm5 = vcmask 785408  }
 0x7a6   :  { %v983_v23 = vmul.f32 %v981_v22, %v949_v51 }
 0x7a8   :  { %v988_v11 = vmul.f32 %v2090_v7, %v983_v23 }
 0x7aa   :  { %v2749_v24 = vadd.f32 %v2091_v15, %v988_v11 }
 0x7ac   :  { %2001 = vmatmul.msk.f32.gmra.mxu1 %vm164_vm0, %v2749_v24 }
 0x81e   :  { %v1025_v26 = vpop.f32.mrf.mxu1 }
 0x81f   :  { %v2756_v27 = vadd.f32 %v2092_v25, %v1025_v26 }
 0x821   :  { %1032 = vrot.lane.b32.xlu1 %v2756_v27, %s2318_s10 }
 0x829   :  { %v1028_v28 = vpop.f32.mrf.mxu1  ;;  %1163 = vrot.lane.b32.xlu1 %v2756_v27, %s2317_s3 }
 0x82a   :  { %v2762_v29 = vadd.f32 %v2092_v25, %v1028_v28 }
 0x82c   :  { %1191 = vrot.lane.b32.xlu2 %v2762_v29, %s2317_s3  ;;  %1059 = vrot.lane.b32.xlu0 %v2762_v29, %s2318_s10  ;;  %v2064_v2 = vpack.i.bf16 %v2762_v29, %v2756_v27  ;;  %s3039_s3 = smov 40  }
 0x831   :  { %1321 = vrot.lane.b32.xlu1 %v2762_v29, %s2322_s20 }
 0x834   :  { %1161 = vrot.lane.b32.xlu2 %v2756_v27, %s2320_s6  ;;  %1189 = vrot.lane.b32.xlu0 %v2762_v29, %s2320_s6  ;;  %s3041_s6 = smov 8  }
 0x839   :  { %1455 = vrot.lane.b32.xlu1 %v2762_v29, %s2321_s0 }
 0x83c   :  { %1295 = vrot.lane.b32.xlu2 %v2756_v27, %s2319_s30  ;;  %1323 = vrot.lane.b32.xlu0 %v2762_v29, %s2319_s30  ;;  %s3040_s30 = smov 56  }
 0x841   :  { %1425 = vrot.lane.b32.xlu1 %v2756_v27, %s2323_s11 }
 0x844   :  { %1453 = vrot.lane.b32.xlu2 %v2762_v29, %s2323_s11  ;;  %1293 = vrot.lane.b32.xlu0 %v2756_v27, %s2322_s20  ;;  %s3043_s20 = smov 24  }
 0x84c   :  { %1427 = vrot.lane.b32.xlu0 %v2756_v27, %s2321_s0  ;;  %s3042_s0 = smov 16  }
 0x886   :  { %v1192_v30 = vpop.permute.xlu2 %1191 }
 0x887   :  { %2010 = vmatpush.xpose.msk.msrb.mxu3 %vm197_vm1, %v1192_v30 }
 0x88e   :  { %v1162_v32 = vpop.permute.xlu2 %1161 }
 0x893   :  { %v1033_v31 = vpop.permute.xlu1 %1032 }
 0x894   :  { %2002 = vmatpush.xpose.msk.msra.mxu2 %vm197_vm1, %v1033_v31 }
 0x896   :  { %v1296_v35 = vpop.permute.xlu2 %1295 }
 0x897   :  { %2003 = vmatmul.msk.f32.vlgmr.msra.gmra.mxu2 %vm197_vm1, %v2756_v27 }
 0x89b   :  { %v1164_v33 = vpop.permute.xlu1 %1163 }
 0x89e   :  { %v1060_v34 = vpop.permute.xlu0 %1059  ;;  %v1454_v41 = vpop.permute.xlu2 %1453 }
 0x89f   :  { %2004 = vmatpush.xpose.msk.msra.mxu0 %vm197_vm1, %v1060_v34 }
 0x8a2   :  { %2005 = vmatmul.msk.f32.vlgmr.msra.gmra.mxu0 %vm197_vm1, %v2762_v29 }
 0x8a3   :  { %2008 = vmatpush.xpose.msk.msrb.mxu0 %vm197_vm1, %v1164_v33  ;;  %v1322_v36 = vpop.permute.xlu1 %1321 }
 0x8a6   :  { %v1190_v37 = vpop.permute.xlu0 %1189 }
 0x8a7   :  { %2014 = vmatpush.xpose.msk.msra.mxu0 %vm197_vm1, %v1296_v35  ;;  %2011 = vmatmul.msk.f32.vlgmr.msrb.gmra.mxu3 %vm197_vm1, %v1190_v37 }
 0x8aa   :  { %2009 = vmatmul.msk.f32.vlgmr.msrb.gmra.mxu0 %vm197_vm1, %v1162_v32 }
 0x8ab   :  { %v1456_v39 = vpop.permute.xlu1 %1455 }
 0x8ae   :  { %v1324_v38 = vpop.permute.xlu0 %1323 }
 0x8af   :  { %2016 = vmatpush.xpose.msk.msra.mxu3 %vm197_vm1, %v1324_v38 }
 0x8b2   :  { %2017 = vmatmul.msk.f32.vlgmr.msra.gmra.mxu3 %vm197_vm1, %v1322_v36 }
 0x8b3   :  { %2022 = vmatpush.xpose.msk.msrb.mxu3 %vm197_vm1, %v1456_v39  ;;  %v1426_v6 = vpop.permute.xlu1 %1425 }
 0x8b6   :  { %v1294_v40 = vpop.permute.xlu0 %1293 }
 0x8b7   :  { %2015 = vmatmul.msk.f32.vlgmr.msra.gmra.mxu0 %vm197_vm1, %v1294_v40 }
 0x8ba   :  { %2023 = vmatmul.msk.f32.vlgmr.msrb.gmra.mxu3 %vm197_vm1, %v1454_v41 }
 0x8be   :  { %v1428_v42 = vpop.permute.xlu0 %1427 }
 0x8bf   :  { %2020 = vmatpush.xpose.msk.msrb.mxu0 %vm197_vm1, %v1428_v42 }
 0x8c2   :  { %2021 = vmatmul.msk.f32.vlgmr.msrb.gmra.mxu0 %vm197_vm1, %v1426_v6 }
 0x91a   :  { %v1055_v44 = vpop.f32.mrf.mxu2 }
 0x91b   :  { %v1085_v45 = vmul.f32 0.35355338, %v1055_v44 }
 0x91d   :  { %v1087_v13 = vsel %vm197_vm1, %v1085_v45, -inf }
 0x91e   :  { %1088 = vmax.xlane.f32.xlu2 %v1087_v13 }
 0x91f   :  { %v1082_v8 = vpop.f32.mrf.mxu0 }
 0x920   :  { %v1086_v46 = vmul.f32 0.35355338, %v1082_v8 }
 0x922   :  { %v1090_v47 = vsel %vm197_vm1, %v1086_v46, -inf }
 0x923   :  { %1091 = vmax.xlane.f32.xlu0 %v1090_v47 }
 0x927   :  { %v1186_v48 = vpop.f32.mrf.mxu0 }
 0x928   :  { %v1217_v49 = vmul.f32 0.35355338, %v1186_v48 }
 0x92a   :  { %v1214_v50 = vpop.f32.mrf.mxu3  ;;  %v1219_v51 = vsel %vm197_vm1, %v1217_v49, -inf }
 0x92b   :  { %v1218_v52 = vmul.f32 0.35355338, %v1214_v50  ;;  %1220 = vmax.xlane.f32.xlu1 %v1219_v51 }
 0x92d   :  { %v1222_v53 = vsel %vm197_vm1, %v1218_v52, -inf }
 0x92e   :  { %1223 = vmax.xlane.f32.xlu2 %v1222_v53 }
 0x934   :  { %v1318_v54 = vpop.f32.mrf.mxu0 }
 0x935   :  { %v1349_v55 = vmul.f32 0.35355338, %v1318_v54  ;;  %v1346_v56 = vpop.f32.mrf.mxu3 }
 0x936   :  { %v1350_v57 = vmul.f32 0.35355338, %v1346_v56 }
 0x937   :  { %v1351_v58 = vsel %vm197_vm1, %v1349_v55, -inf }
 0x938   :  { %1352 = vmax.xlane.f32.xlu0 %v1351_v58  ;;  %v1354_v59 = vsel %vm197_vm1, %v1350_v57, -inf }
 0x939   :  { %1355 = vmax.xlane.f32.xlu1 %v1354_v59 }
 0x93d   :  { %v1478_v60 = vpop.f32.mrf.mxu3 }
 0x93e   :  { %v1482_v61 = vmul.f32 0.35355338, %v1478_v60 }
 0x93f   :  { %v1450_v62 = vpop.f32.mrf.mxu0 }
 0x940   :  { %v1481_v63 = vmul.f32 0.35355338, %v1450_v62  ;;  %v1486_v0 = vsel %vm197_vm1, %v1482_v61, -inf }
 0x941   :  { %1487 = vmax.xlane.f32.xlu0 %v1486_v0 }
 0x942   :  { %v1483_v1 = vsel %vm197_vm1, %v1481_v63, -inf }
 0x943   :  { %1484 = vmax.xlane.f32.xlu2 %v1483_v1 }
 0x952   :  { %2065 = vrot.lane.b32.xlu1 %v2064_v2, %s2325_s28 }
 0x991   :  { %v1089_v3 = vpop.xlane.xlu2 %1088 }
 0x992   :  { %v1093_v4 = vsub.f32 %v1085_v45, %v1089_v3 }
 0x994   :  { %v1095_v5 = vmul.f32 1.442695, %v1093_v4 }
 0x996   :  { %2143 = vpow2.f32 %v1095_v5  ;;  %v1092_v7 = vpop.xlane.xlu0 %1091 }
 0x997   :  { %v1094_v9 = vsub.f32 %v1086_v46, %v1092_v7 }
 0x999   :  { %v1097_v10 = vmul.f32 1.442695, %v1094_v9 }
 0x99b   :  { %2145 = vpow2.f32 %v1097_v10 }
 0x99c   :  { %v2144_v12 = vpop.eup %2143 }
 0x99d   :  { %v1099_v14 = vsel %vm197_vm1, %v2144_v12, 0.0 }
 0x99e   :  { %v1221_v15 = vpop.xlane.xlu1 %1220  ;;  %1100 = vadd.xlane.f32.xlu1 %v1099_v14 }
 0x99f   :  { %v1225_v16 = vsub.f32 %v1217_v49, %v1221_v15 }
 0x9a1   :  { %v2146_v17 = vpop.eup %2145  ;;  %v1227_v18 = vmul.f32 1.442695, %v1225_v16  ;;  %v1224_v20 = vpop.xlane.xlu2 %1223 }
 0x9a2   :  { %v1226_v21 = vsub.f32 %v1218_v52, %v1224_v20  ;;  %v1102_v22 = vsel %vm197_vm1, %v2146_v17, 0.0 }
 0x9a3   :  { %2147 = vpow2.f32 %v1227_v18  ;;  %1103 = vadd.xlane.f32.xlu2 %v1102_v22 }
 0x9a4   :  { %v1229_v23 = vmul.f32 1.442695, %v1226_v21 }
 0x9a6   :  { %2149 = vpow2.f32 %v1229_v23 }
 0x9a9   :  { %v2819_v11 = vpop.eup %2147 }
 0x9aa   :  { %v1231_v25 = vsel %vm197_vm1, %v2819_v11, 0.0 }
 0x9ab   :  { %1232 = vadd.xlane.f32.xlu0 %v1231_v25  ;;  %v1353_v27 = vpop.xlane.xlu0 %1352 }
 0x9ac   :  { %v2150_v26 = vpop.eup %2149  ;;  %v1356_v28 = vpop.xlane.xlu1 %1355  ;;  %v1357_v31 = vsub.f32 %v1349_v55, %v1353_v27 }
 0x9ad   :  { %v1358_v29 = vsub.f32 %v1350_v57, %v1356_v28  ;;  %v1234_v30 = vsel %vm197_vm1, %v2150_v26, 0.0 }
 0x9ae   :  { %1235 = vadd.xlane.f32.xlu2 %v1234_v30  ;;  %v1359_v33 = vmul.f32 1.442695, %v1357_v31  ;;  %v1590_v31 = vld [vmem:[%s2985_s16 + $0x18] sm:$0xff] }
 0x9af   :  { %v1361_v32 = vmul.f32 1.442695, %v1358_v29  ;;  %1613 = vmatpush.msra.mxu0 %v1590_v31 }
 0x9b1   :  { %2151 = vpow2.f32 %v1361_v32  ;;  %v1589_v32 = vld [vmem:[%s2985_s16 + $0x10] sm:$0xff] }
 0x9b2   :  { %2153 = vpow2.f32 %v1359_v33  ;;  %v1588_v33 = vld [vmem:[%s2985_s16 + $0x8] sm:$0xff]  ;;  %1614 = vmatpush.msra.mxu0 %v1589_v32 }
 0x9b4   :  { %v1488_v39 = vpop.xlane.xlu0 %1487  ;;  %1615 = vmatpush.msra.mxu0 %v1588_v33 }
 0x9b5   :  { %v1490_v41 = vsub.f32 %v1482_v61, %v1488_v39 }
 0x9b6   :  { %v1485_v34 = vpop.xlane.xlu2 %1484 }
 0x9b7   :  { %v2824_v35 = vpop.eup %2151  ;;  %v1489_v36 = vsub.f32 %v1481_v63, %v1485_v34  ;;  %2075 = vrot.lane.b32.xlu1 %v2064_v2, %s3038_s15  ;;  %v1493_v6 = vmul.f32 1.442695, %v1490_v41  ;;  %v1587_v34 = vld [vmem:[%s2985_s16] sm:$0xff]  ;;  %s3044_s15 = sld [smem:[#allocation28_spill]] }
 0x9b8   :  { %v1366_v37 = vsel %vm197_vm1, %v2824_v35, 0.0  ;;  %v2829_v40 = vpop.eup %2153  ;;  %1616 = vmatpush.msra.mxu0 %v1587_v34 }
 0x9b9   :  { %1367 = vadd.xlane.f32.xlu0 %v1366_v37  ;;  %v1491_v38 = vmul.f32 1.442695, %v1489_v36  ;;  %v1363_v42 = vsel %vm197_vm1, %v2829_v40, 0.0 }
 0x9bb   :  { %2155 = vpow2.f32 %v1491_v38 }
 0x9bc   :  { %2157 = vpow2.f32 %v1493_v6 }
 0x9bf   :  { %2080 = vrot.lane.b32.xlu1 %v2064_v2, %s3039_s3  ;;  %s1956_s3 = sshll.u32 %s3044_s15, 4  ;;  %s1957_s3 = int_to_ptr.hbm [resolvable:$true] %s1956_s3 }
 0x9c1   :  { %1364 = vadd.xlane.f32.xlu0 %v1363_v42  ;;  %v2156_v45 = vpop.eup %2155 }
 0x9c2   :  { %v1495_v46 = vsel %vm197_vm1, %v2156_v45, 0.0  ;;  %v2158_v47 = vpop.eup %2157 }
 0x9c3   :  { %v1498_v48 = vsel %vm197_vm1, %v2158_v47, 0.0 }
 0x9c4   :  { %v2066_v44 = vpop.permute.xlu1 %2065 }
 0x9c5   :  { %v2068_v13 = vunpack.i.h.bf16 %v2066_v44  ;;  %v2067_v8 = vunpack.i.l.bf16 %v2066_v44 }
 0x9c6   :  { %2070 = vrot.lane.b32.xlu2 %v2064_v2, %s3040_s30 }
 0x9c7   :  { %1130 = vmatpush.msra.mxu1 %v2067_v8  ;;  %1156 = vmatpush.msrb.mxu2 %v2068_v13  ;;  %v2093_v8 = vld [vmem:[%s2986_s17] ss:$0 sm:$0xff] }
 0x9c9   :  { %1496 = vadd.xlane.f32.xlu0 %v1495_v46 }
 0x9d1   :  { %1499 = vadd.xlane.f32.xlu0 %v1498_v48 }
 0xa11   :  { %v1101_v49 = vpop.xlane.xlu1 %1100 }
 0xa12   :  { %2159 = vrcp.f32 %v1101_v49 }
 0xa16   :  { %v1104_v50 = vpop.xlane.xlu2 %1103 }
 0xa17   :  { %2161 = vrcp.f32 %v1104_v50 }
 0xa18   :  { %v2160_v51 = vpop.eup %2159 }
 0xa19   :  { %v1107_v52 = vmul.f32 %v2160_v51, %v2144_v12 }
 0xa1b   :  { %2006 = vmatmul.msk.f32.vlgmr.msra.gmra.mxu1 %vm197_vm1, %v1107_v52 }
 0xa1d   :  { %v2162_v53 = vpop.eup %2161 }
 0xa1e   :  { %v1108_v54 = vmul.f32 %v2162_v53, %v2146_v17  ;;  %v1233_v55 = vpop.xlane.xlu0 %1232 }
 0xa1f   :  { %2163 = vrcp.f32 %v1233_v55 }
 0xa20   :  { %2007 = vmatmul.msk.f32.vlgmr.msrb.gmra.mxu2 %vm197_vm1, %v1108_v54 }
 0xa21   :  { %v1236_v56 = vpop.xlane.xlu2 %1235 }
 0xa22   :  { %2165 = vrcp.f32 %v1236_v56 }
 0xa25   :  { %v2164_v57 = vpop.eup %2163 }
 0xa26   :  { %v1239_v1 = vmul.f32 %v2164_v57, %v2819_v11 }
 0xa28   :  { %v2166_v58 = vpop.eup %2165 }
 0xa29   :  { %v2071_v59 = vpop.permute.xlu2 %2070  ;;  %v2076_v60 = vpop.permute.xlu1 %2075  ;;  %v1240_v2 = vmul.f32 %v2166_v58, %v2150_v26 }
 0xa2a   :  { %v2073_v61 = vunpack.i.h.bf16 %v2071_v59  ;;  %v2072_v62 = vunpack.i.l.bf16 %v2071_v59  ;;  %v2078_v63 = vunpack.i.h.bf16 %v2076_v60  ;;  %v2077_v0 = vunpack.i.l.bf16 %v2076_v60 }
 0xa2c   :  { %1262 = vmatpush.msrb.mxu1 %v2072_v62  ;;  %1288 = vmatpush.msra.mxu2 %v2073_v61  ;;  %v1368_v3 = vpop.xlane.xlu0 %1367 }
 0xa2d   :  { %2167 = vrcp.f32 %v1368_v3  ;;  %2012 = vmatmul.msk.f32.vlgmr.msrb.gmra.mxu1 %vm197_vm1, %v1239_v1  ;;  %2013 = vmatmul.msk.f32.vlgmr.msra.gmra.mxu2 %vm197_vm1, %v1240_v2  ;;  %v1682_v1 = vld [vmem:[#allocation7] sm:$0xff] }
 0xa2e   :  { %1394 = vmatpush.msra.mxu1 %v2077_v0  ;;  %1420 = vmatpush.msrb.mxu2 %v2078_v63  ;;  %v1684_v63 = vld [vmem:[#allocation7 + $0x10] sm:$0xff]  ;;  %v1683_v0 = vld [vmem:[#allocation7 + $0x8] sm:$0xff] }
 0xa31   :  { %v2081_v4 = vpop.permute.xlu1 %2080 }
 0xa32   :  { %v2083_v5 = vunpack.i.h.bf16 %v2081_v4  ;;  %v2082_v7 = vunpack.i.l.bf16 %v2081_v4 }
 0xa33   :  { %v2168_v9 = vpop.eup %2167 }
 0xa34   :  { %v1372_v10 = vmul.f32 %v2168_v9, %v2824_v35  ;;  %v1365_v12 = vpop.xlane.xlu0 %1364  ;;  %1526 = vmatpush.msrb.mxu1 %v2082_v7  ;;  %1552 = vmatpush.msra.mxu2 %v2083_v5  ;;  %v1728_v5 = vld [vmem:[%s2991_s22 + $0x38] sm:$0xff]  ;;  %v1727_v7 = vld [vmem:[%s2991_s22 + $0x30] sm:$0xff]  ;;  %v1726_v9 = vld [vmem:[%s2991_s22 + $0x28] sm:$0xff] }
 0xa35   :  { %2169 = vrcp.f32 %v1365_v12 }
 0xa36   :  { %2019 = vmatmul.msk.f32.vlgmr.msrb.gmra.mxu2 %vm197_vm1, %v1372_v10 }
 0xa3b   :  { %v2170_v14 = vpop.eup %2169 }
 0xa3c   :  { %v1371_v15 = vmul.f32 %v2170_v14, %v2829_v40  ;;  %v1497_v16 = vpop.xlane.xlu0 %1496  ;;  %v1725_v14 = vld [vmem:[%s2991_s22 + $0x20] sm:$0xff] }
 0xa3d   :  { %2171 = vrcp.f32 %v1497_v16 }
 0xa3e   :  { %2018 = vmatmul.msk.f32.vlgmr.msra.gmra.mxu1 %vm197_vm1, %v1371_v15 }
 0xa3f   :  { %1747 = vmatpush.msra.mxu1 %v1728_v5 }
 0xa41   :  { %1748 = vmatpush.msra.mxu1 %v1727_v7 }
 0xa43   :  { %v2172_v17 = vpop.eup %2171  ;;  %1749 = vmatpush.msra.mxu1 %v1726_v9 }
 0xa44   :  { %v1503_v18 = vmul.f32 %v2172_v17, %v2156_v45  ;;  %v1500_v20 = vpop.xlane.xlu0 %1499 }
 0xa45   :  { %2173 = vrcp.f32 %v1500_v20  ;;  %1750 = vmatpush.msra.mxu1 %v1725_v14 }
 0xa46   :  { %2024 = vmatmul.msk.f32.vlgmr.msrb.gmra.mxu1 %vm197_vm1, %v1503_v18  ;;  %v1724_v18 = vld [vmem:[%s2991_s22 + $0x18] sm:$0xff] }
 0xa47   :  { %1751 = vmatpush.msra.mxu1 %v1724_v18 }
 0xa4b   :  { %v2174_v21 = vpop.eup %2173 }
 0xa4c   :  { %v1504_v22 = vmul.f32 %v2174_v21, %v2158_v47 }
 0xa4e   :  { %2025 = vmatmul.msk.f32.vlgmr.msra.gmra.mxu2 %vm197_vm1, %v1504_v22 }
 0xa98   :  { %v1132_v23 = vpop.f32.mrf.mxu1 }
 0xaa3   :  { %v1158_v11 = vpop.f32.mrf.mxu2 }
 0xaaa   :  { %v1264_v25 = vpop.f32.mrf.mxu1 }
 0xaab   :  { %1559 = vrot.lane.b32.xlu2 %v1264_v25, %s3041_s6  ;;  %v2094_v25 = vld [vmem:[%s2987_s18] ss:$0 sm:$0xff] }
 0xab0   :  { %v1290_v26 = vpop.f32.mrf.mxu2 }
 0xab3   :  { %1561 = vrot.lane.b32.xlu2 %v1290_v26, %s3041_s6 }
 0xab9   :  { %v1422_v29 = vpop.f32.mrf.mxu2 }
 0xabb   :  { %v1396_v27 = vpop.f32.mrf.mxu1 }
 0xabc   :  { %1567 = vrot.lane.b32.xlu0 %v1396_v27, %s3042_s0 }
 0xac3   :  { %v1528_v28 = vpop.f32.mrf.mxu1 }
 0xac4   :  { %1575 = vrot.lane.b32.xlu1 %v1528_v28, %s3043_s20 }
 0xacc   :  { %1569 = vrot.lane.b32.xlu1 %v1422_v29, %s3042_s0 }
 0xad1   :  { %v1554_v30 = vpop.f32.mrf.mxu2 }
 0xad2   :  { %1577 = vrot.lane.b32.xlu2 %v1554_v30, %s3043_s20  ;;  %v2095_v30 = vld [vmem:[%s2988_s19] ss:$0 sm:$0xff] }
 0xb05   :  { %v1560_v35 = vpop.permute.xlu2 %1559 }
 0xb06   :  { %v1581_v37 = vsel %vm197_vm1, %v1132_v23, %v1560_v35 }
 0xb0d   :  { %v1562_v40 = vpop.permute.xlu2 %1561 }
 0xb0e   :  { %v1582_v42 = vsel %vm197_vm1, %v1158_v11, %v1562_v40  ;;  %v1723_v40 = vld [vmem:[%s2991_s22 + $0x10] sm:$0xff] }
 0xb0f   :  { %1752 = vmatpush.msra.mxu1 %v1723_v40 }
 0xb2c   :  { %v1578_v44 = vpop.permute.xlu2 %1577 }
 0xb2e   :  { %v1568_v36 = vpop.permute.xlu0 %1567 }
 0xb2f   :  { %v1583_v38 = vsel %vm747_vm2, %v1581_v37, %v1568_v36 }
 0xb36   :  { %v1576_v39 = vpop.permute.xlu1 %1575 }
 0xb37   :  { %v1585_v41 = vsel %vm750_vm3, %v1583_v38, %v1576_v39 }
 0xb38   :  { %2026 = vmatmul.msk.f32.vlgmr.msra.gmra.mxu0 %vm164_vm0, %v1585_v41  ;;  %v1722_v41 = vld [vmem:[%s2991_s22 + $0x8] sm:$0xff] }
 0xb39   :  { %1753 = vmatpush.msra.mxu1 %v1722_v41 }
 0xb3e   :  { %v1570_v6 = vpop.permute.xlu1 %1569 }
 0xb3f   :  { %v1584_v45 = vsel %vm747_vm2, %v1582_v42, %v1570_v6  ;;  %v1721_v42 = vld [vmem:[%s2991_s22] sm:$0xff] }
 0xb40   :  { %v1586_v13 = vsel %vm750_vm3, %v1584_v45, %v1578_v44  ;;  %1754 = vmatpush.msra.mxu1 %v1721_v42  ;;  %v2096_v6 = vld [vmem:[%s2990_s21] ss:$0 sm:$0xff] }
 0xb41   :  { %2027 = vmatmul.msk.f32.gmra.mxu0 %vm164_vm0, %v1586_v13 }
 0xbb5   :  { %v1618_v46 = vpop.f32.mrf.mxu0 }
 0xbb6   :  { %v1619_v47 = vadd.f32 %v2093_v8, %v1618_v46 }
 0xbb8   :  { %v1624_v48 = vadd.f32 %v1619_v47, %v2745_v19 }
 0xbba   :  { %v1628_v49 = vsel %vm164_vm0, %v1624_v48, 0.0 }
 0xbbb   :  { %1629 = vadd.xlane.f32.xlu1 %v1628_v49 }
 0xbbe   :  { %v1621_v50 = vpop.f32.mrf.mxu0 }
 0xbbf   :  { %v1622_v51 = vadd.f32 %v2093_v8, %v1621_v50 }
 0xbc1   :  { %v1625_v52 = vadd.f32 %v1622_v51, %v2749_v24  ;;  %v1685_v24 = vld [vmem:[#allocation7 + $0x18] sm:$0xff] }
 0xbc2   :  { %1708 = vmatpush.msra.mxu3 %v1685_v24 }
 0xbc3   :  { %v1631_v53 = vsel %vm164_vm0, %v1625_v52, 0.0 }
 0xbc4   :  { %1632 = vadd.xlane.f32.xlu0 %v1631_v53  ;;  %1709 = vmatpush.msra.mxu3 %v1684_v63 }
 0xbc6   :  { %1710 = vmatpush.msra.mxu3 %v1683_v0 }
 0xbc8   :  { %1711 = vmatpush.msra.mxu3 %v1682_v1 }
 0xc2e   :  { %v1630_v54 = vpop.xlane.xlu1 %1629 }
 0xc2f   :  { %v1634_v55 = vmul.f32 %v1630_v54, %v2659_v43 }
 0xc31   :  { %v1636_v56 = vsub.f32 %v1624_v48, %v1634_v55  ;;  %v2097_v48 = vld [vmem:[%s2992_s23] ss:$0 sm:$0xff] }
 0xc33   :  { %v1638_v57 = vmul.f32 %v1636_v56, %v1636_v56 }
 0xc35   :  { %v1640_v58 = vsel %vm164_vm0, %v1638_v57, 0.0 }
 0xc36   :  { %1641 = vadd.xlane.f32.xlu2 %v1640_v58 }
 0xc37   :  { %v1633_v59 = vpop.xlane.xlu0 %1632 }
 0xc38   :  { %v1635_v19 = vmul.f32 %v1633_v59, %v2659_v43 }
 0xc3a   :  { %v1637_v60 = vsub.f32 %v1625_v52, %v1635_v19 }
 0xc3c   :  { %v1639_v61 = vmul.f32 %v1637_v60, %v1637_v60 }
 0xc3e   :  { %v1643_v62 = vsel %vm164_vm0, %v1639_v61, 0.0 }
 0xc3f   :  { %1644 = vadd.xlane.f32.xlu1 %v1643_v62 }
 0xca9   :  { %v1642_v2 = vpop.xlane.xlu2 %1641 }
 0xcaa   :  { %v1646_v3 = vmul.f32 %v1642_v2, %v2659_v43 }
 0xcac   :  { %v1648_v4 = vadd.f32 1e-05, %v1646_v3 }
 0xcae   :  { %2175 = vrsqrt.f32 %v1648_v4  ;;  %vm1656_vm2 = vweird.f32 %v1648_v4 }
 0xcb2   :  { %v1645_v10 = vpop.xlane.xlu1 %1644 }
 0xcb3   :  { %v1647_v12 = vmul.f32 %v1645_v10, %v2659_v43 }
 0xcb4   :  { %v2176_v15 = vpop.eup %2175 }
 0xcb5   :  { %v1651_v16 = vmul.f32 %v2176_v15, %v1648_v4  ;;  %v1649_v17 = vadd.f32 1e-05, %v1647_v12  ;;  %vm1657_vm1 = vweird.f32 %v2176_v15 }
 0xcb6   :  { %vm1658_vm3 = vmor %vm1656_vm2, %vm1657_vm1 }
 0xcb7   :  { %v1652_v20 = vmul.f32 %v2176_v15, %v1651_v16  ;;  %2177 = vrsqrt.f32 %v1649_v17  ;;  %vm1666_vm7 = vweird.f32 %v1649_v17  ;;  %v1886_v16 = vld [vmem:[#allocation8 + $0x70] sm:$0xff] }
 0xcb9   :  { %v1653_v21 = vmul.f32 0.5, %v1652_v20 }
 0xcbb   :  { %v1654_v22 = vsub.f32 1.5, %v1653_v21 }
 0xcbd   :  { %v2178_v23 = vpop.eup %2177  ;;  %v1655_v11 = vmul.f32 %v2176_v15, %v1654_v22 }
 0xcbe   :  { %v1661_v26 = vmul.f32 %v2178_v23, %v1649_v17  ;;  %vm1667_vm6 = vweird.f32 %v2178_v23 }
 0xcbf   :  { %v1659_v27 = vsel %vm1658_vm3, %v2176_v15, %v1655_v11  ;;  %vm1668_vm8 = vmor %vm1666_vm7, %vm1667_vm6  ;;  %v1887_v15 = vld [vmem:[#allocation8 + $0x78] sm:$0xff] }
 0xcc0   :  { %v1670_v28 = vmul.f32 %v1659_v27, %v1636_v56  ;;  %v1662_v29 = vmul.f32 %v2178_v23, %v1661_v26  ;;  %1908 = vmatpush.msrb.mxu2 %v1887_v15  ;;  %v2099_v27 = vld [vmem:[%s2994_s25] ss:$0 sm:$0xff] }
 0xcc1   :  { %v1873_v15 = vld [vmem:[#allocation8 + $0x8] sm:$0xff] }
 0xcc2   :  { %v1675_v31 = vmul.f32 %v2094_v25, %v1670_v28  ;;  %v1663_v32 = vmul.f32 0.5, %v1662_v29  ;;  %1909 = vmatpush.msrb.mxu2 %v1886_v16  ;;  %v1893_v16 = vld [vmem:[#allocation8 + $0xa8] sm:$0xff] }
 0xcc4   :  { %v1664_v33 = vsub.f32 1.5, %v1663_v32  ;;  %v1680_v34 = vadd.f32 %v2095_v30, %v1675_v31 }
 0xcc6   :  { %v1665_v35 = vmul.f32 %v2178_v23, %v1664_v33  ;;  %2028 = vmatmul.msk.f32.vlgmr.msra.gmra.mxu3 %vm164_vm0, %v1680_v34 }
 0xcc8   :  { %v1669_v36 = vsel %vm1668_vm8, %v2178_v23, %v1665_v35 }
 0xcc9   :  { %v1671_v37 = vmul.f32 %v1669_v36, %v1637_v60 }
 0xccb   :  { %v1676_v38 = vmul.f32 %v2094_v25, %v1671_v37 }
 0xccd   :  { %v1681_v39 = vadd.f32 %v2095_v30, %v1676_v38 }
 0xccf   :  { %2029 = vmatmul.msk.f32.gmra.mxu3 %vm164_vm0, %v1681_v39 }
 0xd49   :  { %v1713_v44 = vpop.f32.mrf.mxu3 }
 0xd4a   :  { %v1714_v45 = vadd.f32 %v2096_v6, %v1713_v44 }
 0xd4c   :  { %v1719_v13 = vmax.f32 %v1714_v45, 0.0 }
 0xd4e   :  { %2030 = vmatmul.msk.f32.vlgmr.msra.gmra.mxu1 %vm906_vm11, %v1719_v13 }
 0xd52   :  { %v1716_v8 = vpop.f32.mrf.mxu3 }
 0xd53   :  { %v1717_v46 = vadd.f32 %v2096_v6, %v1716_v8 }
 0xd55   :  { %v1720_v47 = vmax.f32 %v1717_v46, 0.0 }
 0xd57   :  { %2031 = vmatmul.msk.f32.gmra.mxu1 %vm906_vm11, %v1720_v47 }
 0xdcb   :  { %v1756_v49 = vpop.f32.mrf.mxu1 }
 0xdcc   :  { %v1757_v50 = vadd.f32 %v2097_v48, %v1756_v49 }
 0xdce   :  { %v1762_v51 = vadd.f32 %v1757_v50, %v1680_v34 }
 0xdd0   :  { %v1766_v52 = vsel %vm164_vm0, %v1762_v51, 0.0 }
 0xdd1   :  { %1767 = vadd.xlane.f32.xlu0 %v1766_v52 }
 0xdd4   :  { %v1759_v53 = vpop.f32.mrf.mxu1 }
 0xdd5   :  { %v1760_v54 = vadd.f32 %v2097_v48, %v1759_v53 }
 0xdd7   :  { %v1763_v55 = vadd.f32 %v1760_v54, %v1681_v39 }
 0xdd9   :  { %v1769_v56 = vsel %vm164_vm0, %v1763_v55, 0.0 }
 0xdda   :  { %1770 = vadd.xlane.f32.xlu2 %v1769_v56  ;;  %v1884_v56 = vld [vmem:[#allocation8 + $0x60] sm:$0xff] }
 0xe44   :  { %v1768_v57 = vpop.xlane.xlu0 %1767 }
 0xe45   :  { %v1772_v58 = vmul.f32 %v1768_v57, %v2659_v43  ;;  %v1903_v57 = vld [vmem:[#allocation8 + $0xf8] sm:$0xff] }
 0xe46   :  { %1928 = vmatpush.msrb.mxu0 %v1903_v57 }
 0xe47   :  { %v1774_v59 = vsub.f32 %v1762_v51, %v1772_v58  ;;  %v1902_v58 = vld [vmem:[#allocation8 + $0xf0] sm:$0xff] }
 0xe48   :  { %1929 = vmatpush.msrb.mxu0 %v1902_v58 }
 0xe49   :  { %v1776_v19 = vmul.f32 %v1774_v59, %v1774_v59 }
 0xe4b   :  { %v1778_v60 = vsel %vm164_vm0, %v1776_v19, 0.0  ;;  %v1882_v19 = vld [vmem:[#allocation8 + $0x50] sm:$0xff] }
 0xe4c   :  { %1779 = vadd.xlane.f32.xlu1 %v1778_v60  ;;  %v1881_v60 = vld [vmem:[#allocation8 + $0x48] sm:$0xff] }
 0xe4d   :  { %v1771_v61 = vpop.xlane.xlu2 %1770 }
 0xe4e   :  { %v1773_v62 = vmul.f32 %v1771_v61, %v2659_v43  ;;  %v1901_v61 = vld [vmem:[#allocation8 + $0xe8] sm:$0xff] }
 0xe4f   :  { %1930 = vmatpush.msrb.mxu0 %v1901_v61 }
 0xe50   :  { %v1775_v24 = vsub.f32 %v1763_v55, %v1773_v62  ;;  %v1885_v55 = vld [vmem:[#allocation8 + $0x68] sm:$0xff]  ;;  %v1880_v62 = vld [vmem:[#allocation8 + $0x40] sm:$0xff] }
 0xe51   :  { %1910 = vmatpush.msrb.mxu2 %v1885_v55 }
 0xe52   :  { %v1777_v63 = vmul.f32 %v1775_v24, %v1775_v24 }
 0xe53   :  { %1911 = vmatpush.msrb.mxu2 %v1884_v56 }
 0xe54   :  { %v1781_v0 = vsel %vm164_vm0, %v1777_v63, 0.0  ;;  %v1879_v63 = vld [vmem:[#allocation8 + $0x38] sm:$0xff] }
 0xe55   :  { %1782 = vadd.xlane.f32.xlu0 %v1781_v0  ;;  %v1899_v0 = vld [vmem:[#allocation8 + $0xd8] sm:$0xff] }
 0xebf   :  { %v1780_v1 = vpop.xlane.xlu1 %1779 }
 0xec0   :  { %v1784_v2 = vmul.f32 %v1780_v1, %v2659_v43  ;;  %v1878_v1 = vld [vmem:[#allocation8 + $0x30] sm:$0xff] }
 0xec2   :  { %v1786_v3 = vadd.f32 1e-05, %v1784_v2  ;;  %v1898_v2 = vld [vmem:[#allocation8 + $0xd0] sm:$0xff] }
 0xec4   :  { %2179 = vrsqrt.f32 %v1786_v3  ;;  %vm1794_vm10 = vweird.f32 %v1786_v3 }
 0xec8   :  { %v1783_v4 = vpop.xlane.xlu0 %1782 }
 0xec9   :  { %v1785_v5 = vmul.f32 %v1783_v4, %v2659_v43  ;;  %v2098_v43 = vld [vmem:[%s2993_s24] ss:$0 sm:$0xff]  ;;  %s2331_s24 = smov 32  }
 0xeca   :  { %v2180_v7 = vpop.eup %2179  ;;  %v1897_v4 = vld [vmem:[#allocation8 + $0xc8] sm:$0xff] }
 0xecb   :  { %v1789_v9 = vmul.f32 %v2180_v7, %v1786_v3  ;;  %v1787_v10 = vadd.f32 1e-05, %v1785_v5  ;;  %vm1795_vm9 = vweird.f32 %v2180_v7  ;;  %v1877_v3 = vld [vmem:[#allocation8 + $0x28] sm:$0xff]  ;;  %v1876_v5 = vld [vmem:[#allocation8 + $0x20] sm:$0xff] }
 0xecc   :  { %vm1796_vm12 = vmor %vm1794_vm10, %vm1795_vm9 }
 0xecd   :  { %v1790_v12 = vmul.f32 %v2180_v7, %v1789_v9  ;;  %2181 = vrsqrt.f32 %v1787_v10  ;;  %vm1804_vm14 = vweird.f32 %v1787_v10  ;;  %v1875_v9 = vld [vmem:[#allocation8 + $0x18] sm:$0xff] }
 0xecf   :  { %v1791_v14 = vmul.f32 0.5, %v1790_v12  ;;  %v1874_v12 = vld [vmem:[#allocation8 + $0x10] sm:$0xff] }
 0xed1   :  { %v1792_v17 = vsub.f32 1.5, %v1791_v14  ;;  %v1894_v14 = vld [vmem:[#allocation8 + $0xb0] sm:$0xff] }
 0xed3   :  { %v2182_v18 = vpop.eup %2181  ;;  %v1793_v20 = vmul.f32 %v2180_v7, %v1792_v17  ;;  %v1872_v17 = vld [vmem:[#allocation8] sm:$0xff] }
 0xed4   :  { %v1799_v21 = vmul.f32 %v2182_v18, %v1787_v10  ;;  %vm1805_vm13 = vweird.f32 %v2182_v18  ;;  %v1895_v10 = vld [vmem:[#allocation8 + $0xb8] sm:$0xff] }
 0xed5   :  { %v1797_v22 = vsel %vm1796_vm12, %v2180_v7, %v1793_v20  ;;  %vm1806_vm15 = vmor %vm1804_vm14, %vm1805_vm13  ;;  %v1896_v7 = vld [vmem:[#allocation8 + $0xc0] sm:$0xff]  ;;  %v1891_v20 = vld [vmem:[#allocation8 + $0x98] sm:$0xff] }
 0xed6   :  { %v1800_v23 = vmul.f32 %v2182_v18, %v1799_v21  ;;  %v1808_v11 = vmul.f32 %v1797_v22, %v1774_v59  ;;  %v1883_v59 = vld [vmem:[#allocation8 + $0x58] sm:$0xff]  ;;  %v1890_v21 = vld [vmem:[#allocation8 + $0x90] sm:$0xff]  ;;  %v1889_v22 = vld [vmem:[#allocation8 + $0x88] sm:$0xff] }
 0xed7   :  { %1912 = vmatpush.msrb.mxu2 %v1883_v59 }
 0xed8   :  { %v1801_v25 = vmul.f32 0.5, %v1800_v23  ;;  %v1813_v28 = vmul.f32 %v2098_v43, %v1808_v11  ;;  %v1888_v23 = vld [vmem:[#allocation8 + $0x80] sm:$0xff] }
 0xed9   :  { %1913 = vmatpush.msrb.mxu2 %v1882_v19 }
 0xeda   :  { %v1802_v26 = vsub.f32 1.5, %v1801_v25  ;;  %v1818_v31 = vadd.f32 %v2099_v27, %v1813_v28 }
 0xedb   :  { %1914 = vmatpush.msrb.mxu2 %v1881_v60 }
 0xedc   :  { %v1803_v29 = vmul.f32 %v2182_v18, %v1802_v26  ;;  %v1826_v35 = vrot.slane %v1818_v31, 1  ;;  %v1837_v36 = vrot.slane %v1818_v31, 3  ;;  %v1831_v39 = vrot.slane %v1818_v31, 2 }
 0xedd   :  { %v1843_v45 = vrot.slane %v1818_v31, 4  ;;  %v1847_v47 = vrot.slane %v1818_v31, 5  ;;  %v1853_v51 = vrot.slane %v1818_v31, 6  ;;  %v1859_v52 = vrot.slane %v1818_v31, 7  ;;  %1915 = vmatpush.msrb.mxu2 %v1880_v62 }
 0xede   :  { %v1807_v30 = vsel %vm1806_vm15, %v2182_v18, %v1803_v29  ;;  %v1892_v18 = vld [vmem:[#allocation8 + $0xa0] sm:$0xff] }
 0xedf   :  { %v1809_v32 = vmul.f32 %v1807_v30, %v1775_v24  ;;  %v1900_v24 = vld [vmem:[#allocation8 + $0xe0] sm:$0xff]  ;;  %1916 = vmatpush.msrb.mxu2 %v1879_v63 }
 0xee0   :  { %1931 = vmatpush.msrb.mxu0 %v1900_v24 }
 0xee1   :  { %v1814_v33 = vmul.f32 %v2098_v43, %v1809_v32  ;;  %1917 = vmatpush.msrb.mxu2 %v1878_v1 }
 0xee2   :  { %1932 = vmatpush.msrb.mxu0 %v1899_v0 }
 0xee3   :  { %v1819_v34 = vadd.f32 %v2099_v27, %v1814_v33  ;;  %1918 = vmatpush.msrb.mxu2 %v1877_v3 }
 0xee4   :  { %1933 = vmatpush.msrb.mxu0 %v1898_v2 }
 0xee5   :  { %v1827_v37 = vsel %vm1823_vm4, %v1819_v34, %v1826_v35  ;;  %v1838_v38 = vrot.slane %v1819_v34, 2  ;;  %v1832_v40 = vrot.slane %v1819_v34, 1  ;;  %v1822_v41 = vrot.slane %v1819_v34, 7  ;;  %1919 = vmatpush.msrb.mxu2 %v1876_v5  ;;  %v2100_v35 = vld [vmem:[%s2996_s27] ss:$0 sm:$0xff] }
 0xee6   :  { %1828 = vrot.lane.b32.xlu2 %v1827_v37, %s2331_s24  ;;  %v1844_v42 = vrot.slane %v1819_v34, 3  ;;  %v1848_v8 = vrot.slane %v1819_v34, 4  ;;  %v1854_v48 = vrot.slane %v1819_v34, 5  ;;  %v1860_v49 = vrot.slane %v1819_v34, 6  ;;  %1934 = vmatpush.msrb.mxu0 %v1897_v4 }
 0xee7   :  { %v1839_v6 = vsel %vm1823_vm4, %v1838_v38, %v1837_v36  ;;  %v1833_v44 = vsel %vm1823_vm4, %v1832_v40, %v1831_v39  ;;  %v2947_v13 = vsel %vm1823_vm4, %v1822_v41, %v1818_v31  ;;  %1920 = vmatpush.msrb.mxu2 %v1875_v9 }
 0xee8   :  { %1840 = vrot.lane.b32.xlu0 %v1839_v6, %s2318_s10  ;;  %1834 = vrot.lane.b32.xlu1 %v1833_v44, %s2325_s28  ;;  %v2950_v46 = vsel %vm1823_vm4, %v1844_v42, %v1843_v45  ;;  %v1849_v50 = vsel %vm1823_vm4, %v1848_v8, %v1847_v47  ;;  %v1855_v53 = vsel %vm1823_vm4, %v1854_v48, %v1853_v51 }
 0xee9   :  { %v1861_v54 = vsel %vm1823_vm4, %v1860_v49, %v1859_v52  ;;  %1935 = vmatpush.msrb.mxu0 %v1896_v7  ;;  %1921 = vmatpush.msrb.mxu2 %v1874_v12 }
 0xeeb   :  { %1936 = vmatpush.msrb.mxu0 %v1895_v10  ;;  %1922 = vmatpush.msrb.mxu2 %v1873_v15 }
 0xeed   :  { %1937 = vmatpush.msrb.mxu0 %v1894_v14  ;;  %1923 = vmatpush.msrb.mxu2 %v1872_v17 }
 0xeee   :  { %1850 = vrot.lane.b32.xlu2 %v1849_v50, %s2331_s24 }
 0xeef   :  { %1938 = vmatpush.msrb.mxu0 %v1893_v16 }
 0xef0   :  { %1856 = vrot.lane.b32.xlu0 %v1855_v53, %s2325_s28  ;;  %1862 = vrot.lane.b32.xlu1 %v1861_v54, %s2318_s10  ;;  %s2332_s28 = smov [#allocation10]  }
 0xef1   :  { %1939 = vmatpush.msrb.mxu0 %v1892_v18  ;;  %s1954_s2 = sshll.u32 %s2332_s28, 4  ;;  %s1955_s2 = int_to_ptr.vmem [resolvable:$true] %s1954_s2 }
 0xef3   :  { %1940 = vmatpush.msrb.mxu0 %v1891_v20 }
 0xef5   :  { %1941 = vmatpush.msrb.mxu0 %v1890_v21 }
 0xef7   :  { %1942 = vmatpush.msrb.mxu0 %v1889_v22 }
 0xef9   :  { %1943 = vmatpush.msrb.mxu0 %v1888_v23 }
 0xf40   :  { %v1829_v43 = vpop.permute.xlu2 %1828 }
 0xf41   :  { %v1865_v11 = vsel %vm164_vm0, %v2947_v13, %v1829_v43 }
 0xf48   :  { %v1851_v29 = vpop.permute.xlu2 %1850 }
 0xf49   :  { %v1869_v30 = vsel %vm164_vm0, %v2950_v46, %v1851_v29 }
 0xf5a   :  { %v1841_v25 = vpop.permute.xlu0 %1840  ;;  %v1835_v26 = vpop.permute.xlu1 %1834 }
 0xf5b   :  { %v1866_v27 = vsel %vm906_vm11, %v1865_v11, %v1835_v26 }
 0xf5c   :  { %v1868_v28 = vsel %vm1867_vm5, %v1866_v27, %v1841_v25 }
 0xf5d   :  { %1924 = vmatmul.f32.vlgmr.msrb.gmra.mxu2 %v1868_v28 }
 0xf62   :  { %v1857_v31 = vpop.permute.xlu0 %1856  ;;  %v1863_v32 = vpop.permute.xlu1 %1862 }
 0xf63   :  { %v1870_v33 = vsel %vm906_vm11, %v1869_v30, %v1857_v31 }
 0xf64   :  { %v1871_v34 = vsel %vm1867_vm5, %v1870_v33, %v1863_v32 }
 0xf65   :  { %1944 = vmatmul.f32.vlgmr.msrb.gmra.mxu0 %v1871_v34 }
 0xfe0   :  { %v1925_v36 = vpop.f32.mrf.mxu2 }
 0xfe1   :  { %v1926_v37 = vadd.f32 %v2100_v35, %v1925_v36 }
 0xfe2   :  { %v1945_v38 = vpop.f32.mrf.mxu0 }
 0xfe3   :  { %v1946_v39 = vadd.f32 %v1945_v38, %v1926_v37 }
 0xfe5   :  { %1948 = vst [vmem:[#allocation10] sm:$0x3] %v1946_v39 }
 0xfe6   :  { %1959 = dma.vmem_to_hbm [thread:$0]  %s1955_s2, 32, %s1957_s3, [#allocation4]  }
 0xfe7   :  { %2309 = dma.done.wait [#allocation4], 32  }
 0xfe8   :  { %2310 = vsyncadd [#allocation4], 4294967264 }
 0xfe9   :  { %1964 = vsyncpa [#allocation3], 1 }
 0xfea   :  { %1965 = vsyncpa [#allocation6], 1 }
 0xfeb   :  { %1966 = vsyncpa [#allocation9], 1 }
 0xfec   :  { %1967 = vsyncpa [#allocation4], 1 }

</bundles_post_ra>
